<compile_context>
chip_gen: v6e
topology: v6e:2x2x1
jax: 0.10.0
libtpu: 0.0.40
codegen_flags: <defaults>
</compile_context>

<pallas_src>
import functools

import jax
import jax.numpy as jnp
from jax.experimental import pallas as pl
from jax.experimental.pallas import tpu as pltpu

LANES = 128


def _round_up(n, m):
    return ((n + m - 1) // m) * m


def _pad_to(a, shape):
    return jnp.pad(a, [(0, t - s) for s, t in zip(a.shape, shape)])


# ----------------------------------------------------------------------------
# Kernel
# ----------------------------------------------------------------------------
def _bottleneck_kernel(x_ref, w1_ref, b1_ref, w2_ref, b2_ref, w3_ref, b3_ref,
                       o_ref, *, NB, H, W, CIN, WID, COUT):
    R = NB * H * W
    HW = H * W

    # ---- conv1x1 (BN1 scale folded into weights) -> bias -> relu ----------
    x = x_ref[...].reshape(R, CIN)                       # bf16, free reshape
    h1 = jnp.dot(x, w1_ref[...], preferred_element_type=jnp.float32)
    h1 = jnp.maximum(h1 + b1_ref[...], 0.0)              # (R, WID) f32

    # ---- conv3x3 stride=1 pad=1 -> bias -> relu ----------------------------
    # Column (dx) taps: two +-1 row shifts of the flat activation, masked at
    # the x image border, lane-concatenated with the centre tap, then cast to
    # bf16 once:
    #   h_cat[:,      0:  WID] = input pixel (y, x-1)   (kx = 0)
    #   h_cat[:,   WID:2*WID]  = input pixel (y, x  )   (kx = 1)
    #   h_cat[:, 2*WID:3*WID]  = input pixel (y, x+1)   (kx = 2)
    rows = jax.lax.broadcasted_iota(jnp.int32, (R, 1), 0)
    xx = rows % W
    h1d = jnp.concatenate([h1, h1], axis=0)              # (2R, WID) f32
    v_m = jnp.where(xx >= 1, h1d[R - 1:2 * R - 1, :], 0.0)   # == h1[r-1]
    v_p = jnp.where(xx <= W - 2, h1d[1:R + 1, :], 0.0)       # == h1[r+1]
    h_cat = jnp.concatenate([v_m, h1, v_p], axis=1).astype(jnp.bfloat16)

    # Row (dy) taps: zero-pad each image with one row (W flat rows) above and
    # below so the ky=0 / ky=2 taps are static, cross-image-correct slices and
    # need no border mask; the ky=1 tap is h_cat itself (no slice, no copy).
    h3d = h_cat.reshape(NB, HW, 3 * WID)
    zrow = jnp.zeros((NB, W, 3 * WID), jnp.bfloat16)
    hp = jnp.concatenate([zrow, h3d, zrow], axis=1)      # (NB, (H+2)*W, 3*WID)
    t_top = hp[:, 0:HW, :].reshape(R, 3 * WID)                # row y-1 (ky=0)
    t_bot = hp[:, 2 * W:2 * W + HW, :].reshape(R, 3 * WID)    # row y+1 (ky=2)

    # Grouped matmuls: one K = 3*WID contraction per kernel row.
    acc = jnp.dot(t_top, w2_ref[0], preferred_element_type=jnp.float32)
    acc = acc + jnp.dot(h_cat, w2_ref[1], preferred_element_type=jnp.float32)
    acc = acc + jnp.dot(t_bot, w2_ref[2], preferred_element_type=jnp.float32)
    h2 = jnp.maximum(acc + b2_ref[...], 0.0)             # (R, WID) f32

    # ---- conv1x1 (BN3 scale folded) -> bias --------------------------------
    h3 = jnp.dot(h2.astype(jnp.bfloat16), w3_ref[...],
                 preferred_element_type=jnp.float32)
    h3 = h3 + b3_ref[...]                                # (R, COUT) f32

    # ---- identity residual + relu (CIN == COUT, same lane padding) ---------
    # Re-read x_ref here (already resident in VMEM) instead of keeping a flat
    # copy live across the whole kernel.
    res = x_ref[...].reshape(R, COUT).astype(jnp.float32)
    out = jnp.maximum(h3 + res, 0.0)
    o_ref[...] = out.astype(o_ref.dtype).reshape(NB, H, W, COUT)


# ----------------------------------------------------------------------------
# Wrapper
# ----------------------------------------------------------------------------
def _pick_nb(n, hw, target_rows=1024):
    """Images per grid step: divisor of n, nb*hw a multiple of 8 when possible,
    <= target_rows rows per step, and >= 2 grid steps when n > 1 (v7x has two
    TensorCores; a single-step grid idles one of them)."""
    cap = min(n, max(1, target_rows // hw))
    if n > 1:
        cap = min(cap, n // 2)
    cap = max(cap, 1)
    divisors = [d for d in range(1, cap + 1) if n % d == 0]
    aligned = [d for d in divisors if (d * hw) % 8 == 0]
    return max(aligned) if aligned else max(divisors)


def bottleneck_pallas(x_nhwc, kp, target_rows=1024):
    """x_nhwc: (N, H, W, Cin) float32/bfloat16.  Returns (N, H, W, Cout) bf16."""
    N, H, W, Cin = x_nhwc.shape
    cin_p, wid_p, cout_p = kp["cin_p"], kp["wid_p"], kp["cout_p"]
    assert Cin == kp["cin"], "input channels do not match the parameters"
    assert kp["cin"] == kp["cout"], \
        "identity shortcut requires inplanes == planes * expansion"
    # TODO(synk): stride>1 / downsample shortcut not implemented.

    # Pad channels to 128 lanes (lane-dense loads/stores, unmasked MXU tiles)
    # and cast activations to bf16 once (halves HBM traffic; kernel is
    # HBM-bound at real ResNet shapes).
    xp = _pad_to(x_nhwc, (N, H, W, cin_p)).astype(jnp.bfloat16)

    nb = _pick_nb(N, H * W, target_rows)
    grid = (N // nb,)

    kernel = functools.partial(_bottleneck_kernel, NB=nb, H=H, W=W,
                               CIN=cin_p, WID=wid_p, COUT=cout_p)

    full = lambda a: pl.BlockSpec(a.shape, lambda n: (0,) * a.ndim)

    flops = 2 * N * H * W * (cin_p * wid_p + 9 * wid_p * wid_p
                             + wid_p * cout_p)
    bytes_accessed = (
        xp.size * 2 + N * H * W * cout_p * 2
        + 2 * (kp["w1"].size + kp["w2"].size + kp["w3"].size)
        + 4 * (kp["b1"].size + kp["b2"].size + kp["b3"].size))

    out_p = pl.pallas_call(
        kernel,
        out_shape=jax.ShapeDtypeStruct((N, H, W, cout_p), jnp.bfloat16),
        grid_spec=pltpu.PrefetchScalarGridSpec(
            num_scalar_prefetch=0,
            grid=grid,
            in_specs=[
                pl.BlockSpec((nb, H, W, cin_p), lambda n: (n, 0, 0, 0)),
                full(kp["w1"]), full(kp["b1"]),
                full(kp["w2"]), full(kp["b2"]),
                full(kp["w3"]), full(kp["b3"]),
            ],
            out_specs=pl.BlockSpec((nb, H, W, cout_p), lambda n: (n, 0, 0, 0)),
        ),
        compiler_params=pltpu.CompilerParams(
            dimension_semantics=("parallel",),
            vmem_limit_bytes=48 * 1024 * 1024),
        cost_estimate=pl.CostEstimate(
            flops=int(flops), transcendentals=0,
            bytes_accessed=int(bytes_accessed)),
    )(xp, kp["w1"], kp["b1"], kp["w2"], kp["b2"], kp["w3"], kp["b3"])

    return out_p[..., :kp["cout"]]


# ----------------------------------------------------------------------------
# Parameter construction (PyTorch-style) and preprocessing for the kernel
# ----------------------------------------------------------------------------
def make_params(key, inplanes, planes, base_width=64, expansion=4):
    """PyTorch-layout parameters: conv weights OIHW, BN (gamma,beta,mean,var)."""
    width = int(planes * base_width / 64)
    cout = planes * expansion
    ks = jax.random.split(key, 6)

    def bn_params(k, c):
        kg, kb, km, kv = jax.random.split(k, 4)
        gamma = 1.0 + 0.1 * jax.random.normal(kg, (c,), jnp.float32)
        beta = 0.1 * jax.random.normal(kb, (c,), jnp.float32)
        mean = 0.1 * jax.random.normal(km, (c,), jnp.float32)
        var = jnp.abs(jax.random.normal(kv, (c,), jnp.float32)) + 0.5
        return (gamma, beta, mean, var)

    return dict(
        conv1=0.1 * jax.random.normal(ks[0], (width, inplanes, 1, 1), jnp.float32),
        conv2=0.1 * jax.random.normal(ks[1], (width, width, 3, 3), jnp.float32),
        conv3=0.1 * jax.random.normal(ks[2], (cout, width, 1, 1), jnp.float32),
        bn1=bn_params(ks[3], width),
        bn2=bn_params(ks[4], width),
        bn3=bn_params(ks[5], cout),
    )


def prepare_kernel_params(p, eps=1e-5):
    """Fold BN into weights/biases, transpose to matmul layout, pad, cast.

    conv2 is stored grouped per kernel row: w2[ky] has shape (3*wid_p, wid_p),
    rows [kx*wid_p:(kx+1)*wid_p] holding the (in, out) weights for column kx,
    matching the kernel's lane-concatenated activation layout.
    """
    def fold(gamma, beta, mean, var):
        s = gamma / jnp.sqrt(var + eps)
        return s, beta - mean * s

    s1, b1 = fold(*p["bn1"])
    s2, b2 = fold(*p["bn2"])
    s3, b3 = fold(*p["bn3"])

    w1 = jnp.transpose(p["conv1"][:, :, 0, 0], (1, 0)) * s1[None, :]        # (Cin, width)
    w2 = jnp.transpose(p["conv2"], (2, 3, 1, 0)) * s2[None, None, None, :]  # (ky,kx,in,out)
    w3 = jnp.transpose(p["conv3"][:, :, 0, 0], (1, 0)) * s3[None, :]        # (width, Cout)

    cin, width = w1.shape
    cout = w3.shape[1]
    cin_p = _round_up(cin, LANES)
    wid_p = _round_up(width, LANES)
    cout_p = _round_up(cout, LANES)

    w2g = (_pad_to(w2, (3, 3, wid_p, wid_p))
           .reshape(3, 3 * wid_p, wid_p).astype(jnp.bfloat16))

    return dict(
        w1=_pad_to(w1, (cin_p, wid_p)).astype(jnp.bfloat16),
        w2=w2g,
        w3=_pad_to(w3, (wid_p, cout_p)).astype(jnp.bfloat16),
        b1=_pad_to(b1[None, :], (1, wid_p)).astype(jnp.float32),
        b2=_pad_to(b2[None, :], (1, wid_p)).astype(jnp.float32),
        b3=_pad_to(b3[None, :], (1, cout_p)).astype(jnp.float32),
        cin=cin, cout=cout, cin_p=cin_p, wid_p=wid_p, cout_p=cout_p,
    )


# ----------------------------------------------------------------------------
# Pure-JAX reference (float32, eval-mode BN) for validation
# ----------------------------------------------------------------------------
def reference(x_nhwc, p, eps=1e-5):
    dn = ("NHWC", "OIHW", "NHWC")

    def bn(h, gamma, beta, mean, var):
        return (h - mean) / jnp.sqrt(var + eps) * gamma + beta

    h = jax.lax.conv_general_dilated(x_nhwc, p["conv1"], (1, 1), "SAME",
                                     dimension_numbers=dn)
    h = jax.nn.relu(bn(h, *p["bn1"]))
    h = jax.lax.conv_general_dilated(h, p["conv2"], (1, 1), "SAME",
                                     dimension_numbers=dn)
    h = jax.nn.relu(bn(h, *p["bn2"]))
    h = jax.lax.conv_general_dilated(h, p["conv3"], (1, 1), "SAME",
                                     dimension_numbers=dn)
    h = bn(h, *p["bn3"])
    return jax.nn.relu(h + x_nhwc)


if __name__ == "__main__":
    key = jax.random.PRNGKey(0)
    kx_, kp_ = jax.random.split(key)

    # Bottleneck(inplanes=16, planes=4) -> width=4, out channels=16 (identity
    # shortcut).  PyTorch-style NCHW input: (N=2, C=16, H=8, W=8).
    N, C, H, W = 2, 16, 8, 8
    x_nchw = jax.random.normal(kx_, (N, C, H, W), jnp.float32)
    tparams = make_params(kp_, inplanes=C, planes=4)

    x_nhwc = jnp.transpose(x_nchw, (0, 2, 3, 1))
    kparams = prepare_kernel_params(tparams)

    out_nhwc = bottleneck_pallas(x_nhwc, kparams)            # bf16
    out_nchw = jnp.transpose(out_nhwc, (0, 3, 1, 2)).astype(jnp.float32)
    jax.block_until_ready(out_nchw)

    ref = reference(x_nhwc, tparams)
    max_err = float(jnp.max(jnp.abs(out_nhwc.astype(jnp.float32) - ref)))
    # bf16 matmul operands + bf16 activation I/O (f32 accumulation inside)
    # -> relaxed tolerance vs the f32 reference.
    assert max_err < 1e-1, f"mismatch vs reference: max abs err = {max_err}"

    print("KERNEL_OK")
</pallas_src>

<mosaic_0001>
module attributes {stable_mosaic.version = 11 : i64} {
  func.func @_bottleneck_kernel(%arg0: i32, %arg1: memref<1x8x8x128xbf16, #tpu.memory_space<vmem>>, %arg2: memref<128x128xbf16, #tpu.memory_space<vmem>>, %arg3: memref<1x128xf32, #tpu.memory_space<vmem>>, %arg4: memref<3x384x128xbf16, #tpu.memory_space<vmem>>, %arg5: memref<1x128xf32, #tpu.memory_space<vmem>>, %arg6: memref<128x128xbf16, #tpu.memory_space<vmem>>, %arg7: memref<1x128xf32, #tpu.memory_space<vmem>>, %arg8: memref<1x8x8x128xbf16, #tpu.memory_space<vmem>>) attributes {dimension_semantics = [#tpu.dimension_semantics<parallel>], iteration_bounds = array<i64: 2>, scalar_prefetch = 0 : i64, scratch_operands = 0 : i64, tpu.core_type = #tpu.core_type<tc>, window_params = [{transform_indices = @transform_0, window_bounds = array<i64: 1, 8, 8, 128>}, {pipeline_mode = #tpu.pipeline_mode<synchronous>, transform_indices = @transform_1, window_bounds = array<i64: 128, 128>}, {pipeline_mode = #tpu.pipeline_mode<synchronous>, transform_indices = @transform_2, window_bounds = array<i64: 1, 128>}, {pipeline_mode = #tpu.pipeline_mode<synchronous>, transform_indices = @transform_3, window_bounds = array<i64: 3, 384, 128>}, {pipeline_mode = #tpu.pipeline_mode<synchronous>, transform_indices = @transform_4, window_bounds = array<i64: 1, 128>}, {pipeline_mode = #tpu.pipeline_mode<synchronous>, transform_indices = @transform_5, window_bounds = array<i64: 128, 128>}, {pipeline_mode = #tpu.pipeline_mode<synchronous>, transform_indices = @transform_6, window_bounds = array<i64: 1, 128>}, {transform_indices = @transform_7, window_bounds = array<i64: 1, 8, 8, 128>}]} {
    %c0 = arith.constant 0 : index
    %c0_0 = arith.constant 0 : index
    %c0_1 = arith.constant 0 : index
    %c0_2 = arith.constant 0 : index
    %0 = vector.load %arg1[%c0, %c0_0, %c0_1, %c0_2] : memref<1x8x8x128xbf16, #tpu.memory_space<vmem>>, vector<1x8x8x128xbf16>
    %1 = vector.shape_cast %0 : vector<1x8x8x128xbf16> to vector<64x128xbf16>
    %c0_3 = arith.constant 0 : index
    %c0_4 = arith.constant 0 : index
    %2 = vector.load %arg2[%c0_3, %c0_4] : memref<128x128xbf16, #tpu.memory_space<vmem>>, vector<128x128xbf16>
    %cst = arith.constant dense<0.000000e+00> : vector<64x128xf32>
    %3 = tpu.matmul %1, %2, %cst {dimension_numbers = #tpu.dot_dimension_numbers<[1], [0], [0], [1], [0, 0, 1, 1], [], []>} : vector<64x128xbf16>, vector<128x128xbf16>, vector<64x128xf32> -> vector<64x128xf32>
    %c0_5 = arith.constant 0 : index
    %c0_6 = arith.constant 0 : index
    %4 = vector.load %arg3[%c0_5, %c0_6] : memref<1x128xf32, #tpu.memory_space<vmem>>, vector<1x128xf32>
    %5 = vector.broadcast %4 : vector<1x128xf32> to vector<64x128xf32>
    %6 = arith.addf %3, %5 : vector<64x128xf32>
    %cst_7 = arith.constant 0.000000e+00 : f32
    %7 = vector.broadcast %cst_7 : f32 to vector<64x128xf32>
    %8 = arith.maximumf %6, %7 : vector<64x128xf32>
    %9 = tpu.iota {dimensions = array<i32: 0>} : vector<64x1xi32>
    %c8_i32 = arith.constant 8 : i32
    %c0_i32 = arith.constant 0 : i32
    %10 = arith.cmpi eq, %c8_i32, %c0_i32 : i32
    %c1_i32 = arith.constant 1 : i32
    %11 = arith.select %10, %c1_i32, %c8_i32 : i32
    %12 = vector.broadcast %11 : i32 to vector<64x1xi32>
    %13 = arith.remsi %9, %12 : vector<64x1xi32>
    %c0_i32_8 = arith.constant 0 : i32
    %14 = vector.broadcast %c0_i32_8 : i32 to vector<64x1xi32>
    %15 = arith.cmpi ne, %13, %14 : vector<64x1xi32>
    %c0_i32_9 = arith.constant 0 : i32
    %16 = vector.broadcast %c0_i32_9 : i32 to vector<64x1xi32>
    %17 = arith.cmpi slt, %13, %16 : vector<64x1xi32>
    %c0_i32_10 = arith.constant 0 : i32
    %18 = arith.cmpi slt, %11, %c0_i32_10 : i32
    %19 = vector.broadcast %18 : i1 to vector<64x1xi1>
    %20 = vector.broadcast %19 : vector<64x1xi1> to vector<64x1xi1>
    %21 = arith.xori %17, %20 : vector<64x1xi1>
    %22 = arith.andi %21, %15 : vector<64x1xi1>
    %23 = vector.broadcast %11 : i32 to vector<64x1xi32>
    %24 = arith.addi %13, %23 : vector<64x1xi32>
    %25 = arith.select %22, %24, %13 : vector<64x1xi1>, vector<64x1xi32>
    %26 = tpu.concatenate %8, %8 in 0 : vector<64x128xf32>, vector<64x128xf32> -> vector<128x128xf32>
    %c1_i32_11 = arith.constant 1 : i32
    %27 = vector.broadcast %c1_i32_11 : i32 to vector<64x1xi32>
    %28 = arith.cmpi sge, %25, %27 : vector<64x1xi32>
    %29 = vector.extract_strided_slice %26 {offsets = [63, 0], sizes = [64, 128], strides = [1, 1]} : vector<128x128xf32> to vector<64x128xf32>
    %cst_12 = arith.constant 0.000000e+00 : f32
    %30 = vector.shape_cast %28 : vector<64x1xi1> to vector<64x1xi1>
    %31 = vector.broadcast %30 : vector<64x1xi1> to vector<64x128xi1>
    %32 = vector.broadcast %cst_12 : f32 to vector<64x128xf32>
    %33 = arith.select %31, %29, %32 : vector<64x128xi1>, vector<64x128xf32>
    %c6_i32 = arith.constant 6 : i32
    %34 = vector.broadcast %c6_i32 : i32 to vector<64x1xi32>
    %35 = arith.cmpi sle, %25, %34 : vector<64x1xi32>
    %36 = vector.extract_strided_slice %26 {offsets = [1, 0], sizes = [64, 128], strides = [1, 1]} : vector<128x128xf32> to vector<64x128xf32>
    %cst_13 = arith.constant 0.000000e+00 : f32
    %37 = vector.shape_cast %35 : vector<64x1xi1> to vector<64x1xi1>
    %38 = vector.broadcast %37 : vector<64x1xi1> to vector<64x128xi1>
    %39 = vector.broadcast %cst_13 : f32 to vector<64x128xf32>
    %40 = arith.select %38, %36, %39 : vector<64x128xi1>, vector<64x128xf32>
    %41 = tpu.concatenate %33, %8, %40 in 1 : vector<64x128xf32>, vector<64x128xf32>, vector<64x128xf32> -> vector<64x384xf32>
    %42 = arith.truncf %41 : vector<64x384xf32> to vector<64x384xbf16>
    %43 = vector.shape_cast %42 : vector<64x384xbf16> to vector<1x64x384xbf16>
    %cst_14 = arith.constant 0.000000e+00 : bf16
    %44 = vector.broadcast %cst_14 : bf16 to vector<1x8x384xbf16>
    %45 = tpu.concatenate %44, %43, %44 in 1 : vector<1x8x384xbf16>, vector<1x64x384xbf16>, vector<1x8x384xbf16> -> vector<1x80x384xbf16>
    %46 = vector.extract_strided_slice %45 {offsets = [0, 0, 0], sizes = [1, 64, 384], strides = [1, 1, 1]} : vector<1x80x384xbf16> to vector<1x64x384xbf16>
    %47 = vector.shape_cast %46 : vector<1x64x384xbf16> to vector<64x384xbf16>
    %48 = vector.extract_strided_slice %45 {offsets = [0, 16, 0], sizes = [1, 64, 384], strides = [1, 1, 1]} : vector<1x80x384xbf16> to vector<1x64x384xbf16>
    %49 = vector.shape_cast %48 : vector<1x64x384xbf16> to vector<64x384xbf16>
    %c0_15 = arith.constant 0 : index
    %c0_16 = arith.constant 0 : index
    %c0_17 = arith.constant 0 : index
    %50 = vector.load %arg4[%c0_15, %c0_16, %c0_17] : memref<3x384x128xbf16, #tpu.memory_space<vmem>>, vector<1x384x128xbf16>
    %51 = vector.shape_cast %50 : vector<1x384x128xbf16> to vector<384x128xbf16>
    %cst_18 = arith.constant dense<0.000000e+00> : vector<64x128xf32>
    %52 = tpu.matmul %47, %51, %cst_18 {dimension_numbers = #tpu.dot_dimension_numbers<[1], [0], [0], [1], [0, 0, 1, 1], [], []>} : vector<64x384xbf16>, vector<384x128xbf16>, vector<64x128xf32> -> vector<64x128xf32>
    %c1 = arith.constant 1 : index
    %c0_19 = arith.constant 0 : index
    %c0_20 = arith.constant 0 : index
    %53 = vector.load %arg4[%c1, %c0_19, %c0_20] : memref<3x384x128xbf16, #tpu.memory_space<vmem>>, vector<1x384x128xbf16>
    %54 = vector.shape_cast %53 : vector<1x384x128xbf16> to vector<384x128xbf16>
    %cst_21 = arith.constant dense<0.000000e+00> : vector<64x128xf32>
    %55 = tpu.matmul %42, %54, %cst_21 {dimension_numbers = #tpu.dot_dimension_numbers<[1], [0], [0], [1], [0, 0, 1, 1], [], []>} : vector<64x384xbf16>, vector<384x128xbf16>, vector<64x128xf32> -> vector<64x128xf32>
    %56 = arith.addf %52, %55 : vector<64x128xf32>
    %c2 = arith.constant 2 : index
    %c0_22 = arith.constant 0 : index
    %c0_23 = arith.constant 0 : index
    %57 = vector.load %arg4[%c2, %c0_22, %c0_23] : memref<3x384x128xbf16, #tpu.memory_space<vmem>>, vector<1x384x128xbf16>
    %58 = vector.shape_cast %57 : vector<1x384x128xbf16> to vector<384x128xbf16>
    %cst_24 = arith.constant dense<0.000000e+00> : vector<64x128xf32>
    %59 = tpu.matmul %49, %58, %cst_24 {dimension_numbers = #tpu.dot_dimension_numbers<[1], [0], [0], [1], [0, 0, 1, 1], [], []>} : vector<64x384xbf16>, vector<384x128xbf16>, vector<64x128xf32> -> vector<64x128xf32>
    %60 = arith.addf %56, %59 : vector<64x128xf32>
    %c0_25 = arith.constant 0 : index
    %c0_26 = arith.constant 0 : index
    %61 = vector.load %arg5[%c0_25, %c0_26] : memref<1x128xf32, #tpu.memory_space<vmem>>, vector<1x128xf32>
    %62 = vector.broadcast %61 : vector<1x128xf32> to vector<64x128xf32>
    %63 = arith.addf %60, %62 : vector<64x128xf32>
    %cst_27 = arith.constant 0.000000e+00 : f32
    %64 = vector.broadcast %cst_27 : f32 to vector<64x128xf32>
    %65 = arith.maximumf %63, %64 : vector<64x128xf32>
    %66 = arith.truncf %65 : vector<64x128xf32> to vector<64x128xbf16>
    %c0_28 = arith.constant 0 : index
    %c0_29 = arith.constant 0 : index
    %67 = vector.load %arg6[%c0_28, %c0_29] : memref<128x128xbf16, #tpu.memory_space<vmem>>, vector<128x128xbf16>
    %cst_30 = arith.constant dense<0.000000e+00> : vector<64x128xf32>
    %68 = tpu.matmul %66, %67, %cst_30 {dimension_numbers = #tpu.dot_dimension_numbers<[1], [0], [0], [1], [0, 0, 1, 1], [], []>} : vector<64x128xbf16>, vector<128x128xbf16>, vector<64x128xf32> -> vector<64x128xf32>
    %c0_31 = arith.constant 0 : index
    %c0_32 = arith.constant 0 : index
    %69 = vector.load %arg7[%c0_31, %c0_32] : memref<1x128xf32, #tpu.memory_space<vmem>>, vector<1x128xf32>
    %70 = vector.broadcast %69 : vector<1x128xf32> to vector<64x128xf32>
    %71 = arith.addf %68, %70 : vector<64x128xf32>
    %c0_33 = arith.constant 0 : index
    %c0_34 = arith.constant 0 : index
    %c0_35 = arith.constant 0 : index
    %c0_36 = arith.constant 0 : index
    %72 = vector.load %arg1[%c0_33, %c0_34, %c0_35, %c0_36] : memref<1x8x8x128xbf16, #tpu.memory_space<vmem>>, vector<1x8x8x128xbf16>
    %73 = vector.shape_cast %72 : vector<1x8x8x128xbf16> to vector<64x128xbf16>
    %74 = arith.extf %73 : vector<64x128xbf16> to vector<64x128xf32>
    %75 = arith.addf %71, %74 : vector<64x128xf32>
    %cst_37 = arith.constant 0.000000e+00 : f32
    %76 = vector.broadcast %cst_37 : f32 to vector<64x128xf32>
    %77 = arith.maximumf %75, %76 : vector<64x128xf32>
    %78 = arith.truncf %77 : vector<64x128xf32> to vector<64x128xbf16>
    %79 = vector.shape_cast %78 : vector<64x128xbf16> to vector<1x8x8x128xbf16>
    %c0_38 = arith.constant 0 : index
    %c0_39 = arith.constant 0 : index
    %c0_40 = arith.constant 0 : index
    %c0_41 = arith.constant 0 : index
    %80 = vector.load %arg8[%c0_38, %c0_39, %c0_40, %c0_41] : memref<1x8x8x128xbf16, #tpu.memory_space<vmem>>, vector<1x8x8x128xbf16>
    tpu.vector_store %arg8[%c0_38, %c0_39, %c0_40, %c0_41], %79 {strides = array<i32>} : memref<1x8x8x128xbf16, #tpu.memory_space<vmem>>, vector<1x8x8x128xbf16>,
    return
  }
  func.func @transform_0(%arg0: i32) -> (i32, i32, i32, i32) {
    %c0_i32 = arith.constant 0 : i32
    %c0_i32_0 = arith.constant 0 : i32
    %c0_i32_1 = arith.constant 0 : i32
    %c0_i32_2 = arith.constant 0 : i32
    return %arg0, %c0_i32, %c0_i32_0, %c0_i32_1 : i32, i32, i32, i32
  }
  func.func @transform_1(%arg0: i32) -> (i32, i32) {
    %c0_i32 = arith.constant 0 : i32
    %c0_i32_0 = arith.constant 0 : i32
    %c0_i32_1 = arith.constant 0 : i32
    return %c0_i32, %c0_i32_0 : i32, i32
  }
  func.func @transform_2(%arg0: i32) -> (i32, i32) {
    %c0_i32 = arith.constant 0 : i32
    %c0_i32_0 = arith.constant 0 : i32
    %c0_i32_1 = arith.constant 0 : i32
    return %c0_i32, %c0_i32_0 : i32, i32
  }
  func.func @transform_3(%arg0: i32) -> (i32, i32, i32) {
    %c0_i32 = arith.constant 0 : i32
    %c0_i32_0 = arith.constant 0 : i32
    %c0_i32_1 = arith.constant 0 : i32
    %c0_i32_2 = arith.constant 0 : i32
    return %c0_i32, %c0_i32_0, %c0_i32_1 : i32, i32, i32
  }
  func.func @transform_4(%arg0: i32) -> (i32, i32) {
    %c0_i32 = arith.constant 0 : i32
    %c0_i32_0 = arith.constant 0 : i32
    %c0_i32_1 = arith.constant 0 : i32
    return %c0_i32, %c0_i32_0 : i32, i32
  }
  func.func @transform_5(%arg0: i32) -> (i32, i32) {
    %c0_i32 = arith.constant 0 : i32
    %c0_i32_0 = arith.constant 0 : i32
    %c0_i32_1 = arith.constant 0 : i32
    return %c0_i32, %c0_i32_0 : i32, i32
  }
  func.func @transform_6(%arg0: i32) -> (i32, i32) {
    %c0_i32 = arith.constant 0 : i32
    %c0_i32_0 = arith.constant 0 : i32
    %c0_i32_1 = arith.constant 0 : i32
    return %c0_i32, %c0_i32_0 : i32, i32
  }
  func.func @transform_7(%arg0: i32) -> (i32, i32, i32, i32) {
    %c0_i32 = arith.constant 0 : i32
    %c0_i32_0 = arith.constant 0 : i32
    %c0_i32_1 = arith.constant 0 : i32
    %c0_i32_2 = arith.constant 0 : i32
    return %arg0, %c0_i32, %c0_i32_0, %c0_i32_1 : i32, i32, i32, i32
  }
}

</mosaic_0001>

<bundles_post_ra>
// kernel: tpu_custom_call.1
= control target key start
LH: loop header
LB: loop body
LE: loop exit
PB: predicated region body
PF: predicated region fallthrough
CT: control target
= control target key end

     0   :  { %s3708_s0 = inlined_call_operand.hbm [shape: bf16[2,8,8,128], index: 0, kind: input, shape index: {}]   ;;  %s3709_s1 = inlined_call_operand.hbm [shape: bf16[128,128], index: 1, kind: input, shape index: {}]   ;;  %s3710_s2 = inlined_call_operand.vmem [shape: f32[1,128], index: 2, kind: input, shape index: {}]   ;;  %s3711_s3 = inlined_call_operand.hbm [shape: bf16[3,384,128], index: 3, kind: input, shape index: {}]   ;;  %s3712_s4 = inlined_call_operand.vmem [shape: f32[1,128], index: 4, kind: input, shape index: {}]   ;;  %s3713_s5 = inlined_call_operand.hbm [shape: bf16[128,128], index: 5, kind: input, shape index: {}]   ;;  %s3714_s6 = inlined_call_operand.vmem [shape: f32[1,128], index: 6, kind: input, shape index: {}]   ;;  %s3715_s7 = inlined_call_operand.hbm [shape: bf16[2,8,8,128], index: 7, kind: output, shape index: {}]  }
   0x1   :  { %3722 = sst [smem:[#allocation15_spill]] %s3709_s1 }
   0x2   :  { %12 = vsyncpa [#allocation3], 0 }
   0x3   :  { %14 = vsyncpa [#allocation3 + $0x1], 0 }
   0x4   :  { %15 = vsyncpa [#allocation6], 0 }
   0x5   :  { %16 = vsyncpa [#allocation9], 0 }
   0x6   :  { %17 = vsyncpa [#allocation4], 0 }
   0x7   :  { %19 = vsyncpa [#allocation4 + $0x1], 0  ;;  %s3038_s24 = smov 0   ;;  %s3040_s25 = smov 0  }
   0x8   :  { %s3042_s26 = smov 0   ;;  %s3044_s27 = smov 0  }
   0x9 LB: > { %s3059_s28 = sadd.s32 4294967295, %s2987_s27   ;;  %s2139_s29 = sadd.s32 4294967294, %s2987_s27   ;;  %s2987_s27 = sphi %s3044_s27, %s3778_s27   ;;  %s2983_s26 = sphi %s3042_s26, %s3777_s26   ;;  %s2979_s25 = sphi %s3040_s25, %s3776_s25   ;;  %s2975_s24 = sphi %s3038_s24, %s3775_s24  }
   0xa   : > { %p45_p0 = scmp.ne.s32.totalorder %s2979_s25, %s2975_s24  ;;  %p3716_p1 = scmp.eq.s32.totalorder %s3059_s28, 0 }
   0xb   : > { %p195_p2 = scmp.eq.s32.totalorder %s3059_s28, 1  ;;  %p201_p3 = scmp.eq.s32.totalorder %s2139_s29, 1 }
   0xc   : > { %p3068_p4 = por %p3716_p1, %p45_p0  ;;  %p2140_p5 = scmp.ge.s32.totalorder %s2987_s27, 1 }
   0xd   : > { %p3073_p6 = por %p201_p3, %p45_p0  ;;  %p208_p7 = scmp.lt.s32.totalorder %s2987_s27, 3 }
   0xe   : > { %s3723_s30 = scalar_select %p3068_p4, 1, 0 }
   0xf   : > { %s3724_s8 = scalar_select %p3073_p6, 1, 0 }
  0x10   : > { %p3078_p8 = pnand %p2140_p5, %p208_p7  ;;  %s2989_s10 = smov [#allocation5]  }
  0x11   : > { %s220_s11 = sshll.u32 %s2989_s10, 4  ;;  %s2990_s13 = smov [#allocation7]   ;;  %s221_s11 = int_to_ptr.vmem [resolvable:$true] %s220_s11 }
  0x12   : > { %s3725_s9 = scalar_select %p3078_p8, 1, 0 }
  0x13   : > { %p2644_p9 = pneg %p3078_p8  ;;  %s236_s14 = sshll.u32 %s2990_s13, 4  ;;  %s237_s14 = int_to_ptr.vmem [resolvable:$true] %s236_s14 }
  0x14   : > { %s2991_s15 = smov [#allocation8]   ;;  %s2820_s17 = scalar_lea.vmem %s221_s11, 1024 }
  0x15   : > { %p3087_p11 = pnand %p2644_p9, %p3716_p1  ;;  %s252_s16 = sshll.u32 %s2991_s15, 4  ;;  %s253_s16 = int_to_ptr.vmem [resolvable:$true] %s252_s16 }
  0x16   : > { %p2821_p13 = scmp.ne.s32.totalorder %s221_s11, %s2820_s17  ;;  %p2828_p5 = scmp.lt.s32.totalorder %s221_s11, %s221_s11 }
  0x17   : > { %p2811_p12 = pneg %p3087_p11  ;;  %p2829_p7 = scmp.lt.s32.totalorder %s2820_s17, %s2820_s17 }
  0x19   : > { %p2823_p0 = pnand %p2821_p13, %p2811_p12  ;;  %p2830_p9 = por %p2829_p7, %p2828_p5 }
  0x1b   : > { %p2824_p3 = pneg %p2823_p0 }
  0x1d   : > { %p2831_p10 = pnand %p2830_p9, %p2824_p3 }
  0x1f   : > { %2834 = shalt.err (!%p2831_p10)
}
  0x20   : > { %s3717_s18 = smov 64   ;;  %s3718_s19 = smov 4  }
  0x21   : > { %s3727_s1 = sld [smem:[#allocation15_spill]]  ;;  %s2846_s22 = scalar_lea.vmem %s237_s14, 9216 }
  0x22   : > { %p2847_p13 = scmp.ne.s32.totalorder %s237_s14, %s2846_s22  ;;  %p2854_p3 = scmp.lt.s32.totalorder %s237_s14, %s237_s14 }
  0x23   : > { %p2855_p10 = scmp.lt.s32.totalorder %s2846_s22, %s2846_s22 }
  0x24   : > { %p2849_p0 = pnand %p2847_p13, %p2811_p12 }
  0x25   : > { %p2856_p7 = por %p2855_p10, %p2854_p3 }
  0x26   : > { %p2850_p5 = pneg %p2849_p0 }
  0x27   : > { %2647 = dma.hbm_to_vmem [thread:$0]  (!%p3087_p11), %s3727_s1, 1024, %s221_s11, [#allocation6], %s3717_s18, %s3717_s18, %s3718_s19  }
  0x28   : > { %p2857_p9 = pnand %p2856_p7, %p2850_p5 }
  0x2a   : > { %2860 = shalt.err (!%p2857_p9)
}
  0x2b   : > { %2650 = dma.hbm_to_vmem [thread:$0]  (!%p3087_p11), %s3711_s3, 9216, %s237_s14, [#allocation6], %s3717_s18, %s3717_s18, %s3718_s19  }
  0x2c   : > { %s2872_s10 = scalar_lea.vmem %s253_s16, 1024  ;;  %p2880_p3 = scmp.lt.s32.totalorder %s253_s16, %s253_s16 }
  0x2d   : > { %p2873_p1 = scmp.ne.s32.totalorder %s253_s16, %s2872_s10  ;;  %p2881_p5 = scmp.lt.s32.totalorder %s2872_s10, %s2872_s10 }
  0x2f   : > { %p2875_p13 = pnand %p2873_p1, %p2811_p12  ;;  %p2882_p10 = por %p2881_p5, %p2880_p3 }
  0x31   : > { %p2876_p0 = pneg %p2875_p13 }
  0x33   : > { %p2883_p7 = pnand %p2882_p10, %p2876_p0 }
  0x35   : > { %2886 = shalt.err (!%p2883_p7)
}
  0x36   : > { %2653 = dma.hbm_to_vmem [thread:$0]  (!%p3087_p11), %s3713_s5, 1024, %s253_s16, [#allocation9], %s3717_s18, %s3717_s18, %s3718_s19  }
  0x37   : > { %s3127_s14 = sadd.s32 1, %s2987_s27   ;;  %s32_s15 = sadd.s32 1, %s2983_s26 }
  0x38   : > { %s29_s12 = ssub.s32 %s2987_s27, %s3127_s14  ;;  %p39_p12 = scmp.ne.s32.totalorder %s2983_s26, %s2979_s25 }
  0x39   : > { %p30_p1 = scmp.eq.s32.totalorder %s29_s12, 0  ;;  %p40_p9 = scmp.eq.s32.totalorder %s2987_s27, 0 }
  0x3a   : > { %p2665_p13 = scmp.lt.s32.totalorder %s2987_s27, 2  ;;  %p3141_p3 = por %p195_p2, %p39_p12 }
  0x3b   : > { %s3137_s17 = scalar_select %p30_p1, %s2983_s26, %s32_s15  }
  0x3c   : > { %p41_p0 = por %p40_p9, %p39_p12  ;;  %s269_s21 = sand.u32 1, %s2983_s26  }
  0x3d   : > { %s3728_s20 = scalar_select %p3141_p3, 1, 0 }
  0x3e   : > { %s2295_s22 = sshll.u32 %s2987_s27, 9  ;;  %s2145_s16 = sshll.u32 %s269_s21, 5 }
  0x3f   : > { %s3150_s10 = scalar_lea.hbm %s3708_s0, %s2295_s22  ;;  %s273_s11 = scalar_lea.vmem [#allocation2], %s2145_s16 }
  0x40   : > { %s280_s13 = sshll.u32 %s273_s11, 4  ;;  %p3152_p11 = pnand %p2665_p13, %p41_p0  ;;  %s3156_s13 = int_to_ptr.vmem [resolvable:$true] %s280_s13 }
  0x41   : > { %s3158_s15 = scalar_lea.sflag [#allocation3], %s269_s21  ;;  %s2887_s18 = scalar_lea.hbm %s3150_s10, 512 }
  0x42   : > { %p2888_p2 = scmp.ne.s32.totalorder %s3150_s10, %s2887_s18  ;;  %p2889_p5 = pneg %p3152_p11 }
  0x43   : > { %s2892_s16 = scalar_lea.hbm %s3708_s0, 1024  ;;  %p2893_p1 = scmp.lt.s32.totalorder %s3150_s10, %s3708_s0 }
  0x44   : > { %p2890_p10 = pnand %p2889_p5, %p2888_p2  ;;  %p2894_p12 = scmp.lt.s32.totalorder %s2892_s16, %s2887_s18 }
  0x46   : > { %p2891_p7 = pneg %p2890_p10  ;;  %p2895_p9 = por %p2894_p12, %p2893_p1 }
  0x48   : > { %p2896_p13 = pnand %p2895_p9, %p2891_p7 }
  0x4a   : > { %2899 = shalt.err (!%p2896_p13)
}
  0x4b   : > { %s2900_s21 = scalar_lea.vmem %s3156_s13, 512  ;;  %s2994_s19 = smov [#allocation2]  }
  0x4c   : > { %p2901_p0 = scmp.ne.s32.totalorder %s3156_s13, %s2900_s21  ;;  %s2905_s1 = sshll.u32 %s2994_s19, 4  ;;  %s2906_s1 = int_to_ptr.vmem [resolvable:$false] %s2905_s1 }
  0x4d   : > { %s2907_s22 = scalar_lea.vmem %s2906_s1, 1024  ;;  %p2908_p10 = scmp.lt.s32.totalorder %s3156_s13, %s2906_s1 }
  0x4e   : > { %p2903_p6 = pnand %p2901_p0, %p2889_p5  ;;  %p2909_p3 = scmp.lt.s32.totalorder %s2907_s22, %s2900_s21 }
  0x50   : > { %p2904_p2 = pneg %p2903_p6  ;;  %p2910_p4 = por %p2909_p3, %p2908_p10 }
  0x52   : > { %p2911_p8 = pnand %p2910_p4, %p2904_p2 }
  0x54   : > { %2914 = shalt.err (!%p2911_p8)
}
  0x55   : > { %s3730_s18 = smov 4   ;;  %s3731_s23 = smov 64  }
  0x56   : > { %2657 = dma.hbm_to_vmem [thread:$0]  (!%p3152_p11), %s3150_s10, 512, %s3156_s13, %s3158_s15, %s3731_s23, %s3731_s23, %s3730_s18  }
  0x57   : > { %p3732_p6 = scmp.ne.s32.totalorder %s3725_s9, 0 }
  0x58   : > { %s3185_s19 = sand.u32 (!%p3732_p6), 1, %s2979_s25   ;;  %p3733_p4 = scmp.ne.s32.totalorder (!%p3732_p6), %s3723_s30, 0 }
  0x59   : > { %292 = sbr.rel (%p3732_p6) target bundleno = 869 (0x365), region = 48  ;;  %s2149_s1 = sshll.u32 (!%p3732_p6), %s3185_s19, 5 }
  0x5a   : > { %s295_s16 = scalar_lea.sflag (!%p3732_p6), [#allocation3], %s3185_s19  ;;  %s3191_s12 = scalar_lea.vmem (!%p3732_p6), [#allocation2], %s2149_s1 }
  0x5e   : > { %2958 = dma.done.wait (%p3733_p4), %s295_s16, 512  }
  0x5f   : > { %2960 = vsyncadd (%p3733_p4), %s295_s16, 4294966784  ;;  %p3734_p8 = scmp.eq.s32.totalorder %s3059_s28, 0 }
  0x61   : > { %2962 = dma.done.wait (%p3734_p8), [#allocation6], 10240   ;;  %p3735_p3 = pmov %p3734_p8 }
  0x63   : > { %2964 = vsyncadd (%p3735_p3), [#allocation6], 4294957056  ;;  %p3736_p11 = pmov %p3735_p3 }
  0x64   : > { %p3737_p5 = pmov %p3735_p3 }
  0x65   : > { %2966 = dma.done.wait (%p3736_p11), [#allocation9], 1024  }
  0x66   : > { %2968 = vsyncadd (%p3737_p5), [#allocation9], 4294966272  ;;  %v2709_v0 = vld [vmem:[#allocation5 + $0x38] sm:$0xff]   ;;  %v2710_v1 = vld [vmem:[#allocation5 + $0x30] sm:$0xff]   ;;  %v518_v38 = vlaneseq  ;;  %vm712_vm0 = vcmask 1046528   ;;  %vm655_vm5 = vcmask 1040384  }
  0x67   : > { %2508 = vmatprep.subr.bf16.mxu0 %v2709_v0  ;;  %v2711_v2 = vld [vmem:[#allocation5 + $0x28] sm:$0xff]   ;;  %v2712_v3 = vld [vmem:[#allocation5 + $0x20] sm:$0xff]   ;;  %v2713_v5 = vld [vmem:[#allocation5 + $0x18] sm:$0xff]   ;;  %s3650_s11 = scalar_lea.vmem [#allocation10], %s2149_s1  ;;  %s2304_s22 = sshll.u32 %s3059_s28, 9 }
  0x68   : > { %2509 = vmatpush3.bf16.msra.mxu0 %v2709_v0  ;;  %v342_v4 = vld [vmem:[%s3191_s12] sm:$0xff]   ;;  %v2722_v6 = vld [vmem:[#allocation7 + $0x138] sm:$0xff]   ;;  %v2725_v8 = vld [vmem:[#allocation7 + $0x130] sm:$0xff]   ;;  %v519_v39 = vshrl.u32 %v518_v38, 7  ;;  %s2037_s21 = sshll.u32 %s3650_s11, 4  ;;  %s3663_s1 = scalar_lea.hbm %s3715_s7, %s2304_s22  ;;  %s3658_s21 = int_to_ptr.vmem [resolvable:$true] %s2037_s21 }
  0x69   : > { %2510 = vmatprep.subr.bf16.mxu0 %v2710_v1  ;;  %2524 = vmatprep.mubr.bf16.mxu0 %v342_v4  ;;  %v2723_v7 = vld [vmem:[#allocation7 + $0xf8] sm:$0xff]   ;;  %v2726_v9 = vld [vmem:[#allocation7 + $0xf0] sm:$0xff]   ;;  %v2728_v11 = vld [vmem:[#allocation7 + $0x128] sm:$0xff]   ;;  %s2024_s16 = scalar_lea.sflag [#allocation4], %s3185_s19  ;;  %p3772_p1 = scmp.ne.s32.totalorder %s3728_s20, 0 }
  0x6a   : > { %2340 = vmatprep.subr.bf16.mxu1 %v2722_v6  ;;  %v2714_v10 = vld [vmem:[#allocation5 + $0x10] sm:$0xff]   ;;  %v2729_v12 = vld [vmem:[#allocation7 + $0xe8] sm:$0xff]   ;;  %v2716_v14 = vld [vmem:[#allocation5] sm:$0xff]   ;;  %v3215_v42 = vadd.s32 16, %v519_v39  ;;  %v520_v44 = vadd.s32 8, %v519_v39  ;;  %v3217_v48 = vadd.s32 24, %v519_v39 }
  0x6b   : > { %2341 = vmatpush3.bf16.msra.mxu1 %v2723_v7  ;;  %v2715_v13 = vld [vmem:[#allocation5 + $0x8] sm:$0xff]   ;;  %v346_v16 = vld [vmem:[%s3191_s12 + $0x10] sm:$0xff]   ;;  %v2721_v17 = vld [vmem:[#allocation7 + $0x178] sm:$0xff]   ;;  %v531_v52 = vand.u32 7, %v519_v39  ;;  %v3251_v6 = vadd.s32 32, %v519_v39  ;;  %s2995_s28 = smov [#allocation10]  }
  0x6c   : > { %2511 = vmatpush3.bf16.msra.mxu0 %v2710_v1  ;;  %2342 = vmatprep.subr.bf16.mxu1 %v2725_v8  ;;  %v344_v15 = vld [vmem:[%s3191_s12 + $0x8] sm:$0xff]   ;;  %v2724_v18 = vld [vmem:[#allocation7 + $0x170] sm:$0xff]   ;;  %v348_v19 = vld [vmem:[%s3191_s12 + $0x18] sm:$0xff]   ;;  %v545_v49 = vand.u32 7, %v3215_v42  ;;  %v538_v53 = vand.u32 7, %v520_v44  ;;  %v552_v59 = vand.u32 7, %v3217_v48 }
  0x6d   : > { %2512 = vmatprep.subr.bf16.mxu0 %v2711_v2  ;;  %v2727_v20 = vld [vmem:[#allocation7 + $0x168] sm:$0xff]   ;;  %v2730_v21 = vld [vmem:[#allocation7 + $0x160] sm:$0xff]   ;;  %v2733_v24 = vld [vmem:[#allocation7 + $0x158] sm:$0xff]   ;;  %vm3235_vm2 = vcmp.le.s32.totalorder %v531_v52, 6  ;;  %v3243_v1 = vadd.s32 40, %v519_v39  ;;  %vm3292_vm8 = vcmp.ge.s32.totalorder %v531_v52, 1 }
  0x6e   : > { %v2731_v22 = vld [vmem:[#allocation7 + $0x120] sm:$0xff]   ;;  %v2734_v25 = vld [vmem:[#allocation7 + $0x118] sm:$0xff]   ;;  %v2736_v27 = vld [vmem:[#allocation7 + $0x150] sm:$0xff]   ;;  %vm3229_vm1 = vcmp.le.s32.totalorder %v545_v49, 6  ;;  %vm3239_vm3 = vcmp.le.s32.totalorder %v538_v53, 6  ;;  %vm3247_vm4 = vcmp.ge.s32.totalorder %v538_v53, 1 }
  0x6f   : > { %2343 = vmatpush3.bf16.msra.mxu1 %v2726_v9  ;;  %v2732_v23 = vld [vmem:[#allocation7 + $0xe0] sm:$0xff]   ;;  %v2735_v26 = vld [vmem:[#allocation7 + $0xd8] sm:$0xff]   ;;  %v2737_v28 = vld [vmem:[#allocation7 + $0x110] sm:$0xff]   ;;  %vm3265_vm6 = vcmp.le.s32.totalorder %v552_v59, 6  ;;  %s2919_s30 = sshll.u32 %s2995_s28, 4  ;;  %s2920_s30 = int_to_ptr.vmem [resolvable:$false] %s2919_s30 }
  0x70   : > { %2513 = vmatpush3.bf16.msra.mxu0 %v2711_v2  ;;  %2344 = vmatprep.subr.bf16.mxu1 %v2728_v11  ;;  %v2738_v29 = vld [vmem:[#allocation7 + $0xd0] sm:$0xff]   ;;  %v2739_v30 = vld [vmem:[#allocation7 + $0x148] sm:$0xff]   ;;  %v2742_v33 = vld [vmem:[#allocation7 + $0x140] sm:$0xff]   ;;  %v3258_v11 = vadd.s32 48, %v519_v39  ;;  %s2921_s9 = scalar_lea.vmem %s2920_s30, 1024  ;;  %p2922_p13 = scmp.lt.s32.totalorder %s3658_s21, %s2920_s30 }
  0x71   : > { %2514 = vmatprep.subr.bf16.mxu0 %v2712_v3  ;;  %v2740_v31 = vld [vmem:[#allocation7 + $0x108] sm:$0xff]   ;;  %v2743_v34 = vld [vmem:[#allocation7 + $0x100] sm:$0xff]   ;;  %v3209_v36 = vld [vmem:[#allocation7 + $0xb8] sm:$0xff]  }
  0x72   : > { %v2741_v32 = vld [vmem:[#allocation7 + $0xc8] sm:$0xff]   ;;  %v2744_v35 = vld [vmem:[#allocation7 + $0xc0] sm:$0xff]   ;;  %v2746_v37 = vld [vmem:[#allocation7 + $0x78] sm:$0xff]  }
  0x73   : > { %2345 = vmatpush3.bf16.msra.mxu1 %v2729_v12  ;;  %v2154_v41 = vld [vmem:[%s3710_s2] ss:$0 sm:$0xff]  ;;  %vm2203_vm7 = vmpackc.low %vm3239_vm3, %vm3235_vm2  ;;  %v2751_v0 = vld [vmem:[#allocation7 + $0xa8] sm:$0xff]  }
  0x74   : > { %2515 = vmatpush3.bf16.msra.mxu0 %v2712_v3  ;;  %2346 = vmatprep.subr.bf16.mxu1 %v2731_v22  ;;  %vm2206_vm9 = vmpackc.low %vm3265_vm6, %vm3229_vm1  ;;  %v2753_v42 = vld [vmem:[#allocation7 + $0x28] sm:$0xff]  }
  0x75   : > { %2516 = vmatprep.subr.bf16.mxu0 %v2713_v5  ;;  %vm2191_vm12 = vmpackc.low %vm3247_vm4, %vm3292_vm8 }
  0x77   : > { %2347 = vmatpush3.bf16.msra.mxu1 %v2732_v23 }
  0x78   : > { %2517 = vmatpush3.bf16.msra.mxu0 %v2713_v5  ;;  %2348 = vmatprep.subr.bf16.mxu1 %v2734_v25 }
  0x79   : > { %2518 = vmatprep.subr.bf16.mxu0 %v2714_v10 }
  0x7b   : > { %2349 = vmatpush3.bf16.msra.mxu1 %v2735_v26 }
  0x7c   : > { %2519 = vmatpush3.bf16.msra.mxu0 %v2714_v10  ;;  %2350 = vmatprep.subr.bf16.mxu1 %v2737_v28  ;;  %v573_v28 = vand.u32 7, %v3258_v11  ;;  %v2765_v11 = vld [vmem:[#allocation7 + $0x8] sm:$0xff]  }
  0x7d   : > { %2520 = vmatprep.subr.bf16.mxu0 %v2715_v13 }
  0x7e   : > { %vm3375_vm14 = vcmp.le.s32.totalorder %v573_v28, 6 }
  0x7f   : > { %2351 = vmatpush3.bf16.msra.mxu1 %v2738_v29 }
  0x80   : > { %2521 = vmatpush3.bf16.msra.mxu0 %v2715_v13  ;;  %2352 = vmatprep.subr.bf16.mxu1 %v2740_v31 }
  0x81   : > { %2522 = vmatprep.subr.bf16.mxu0 %v2716_v14 }
  0x83   : > { %2353 = vmatpush3.bf16.msra.mxu1 %v2741_v32 }
  0x84   : > { %2523 = vmatpush3.bf16.msra.mxu0 %v2716_v14  ;;  %2354 = vmatprep.subr.bf16.mxu1 %v2743_v34  ;;  %v2790_v14 = vld [vmem:[#allocation7 + $0x200] sm:$0xff]  }
  0x85   : > { %2532 = vmatprep.subr.bf16.mxu0 %v2721_v17 }
  0x87   : > { %2525 = vmatmul.mubr.bf16.vlgmr.msra.gmra.mxu0 %v344_v15  ;;  %2355 = vmatpush3.bf16.msra.mxu1 %v2744_v35  ;;  %v3269_v15 = vadd.s32 56, %v519_v39 }
  0x88   : > { %2528 = vmatprep.mubr.bf16.mxu0 %v346_v16  ;;  %2533 = vmatpush3.bf16.msra.mxu0 %v2721_v17 }
  0x89   : > { %2534 = vmatprep.subr.bf16.mxu0 %v2724_v18  ;;  %2392 = vmatprep.subr.bf16.mxu1 %v2746_v37  ;;  %v580_v32 = vand.u32 7, %v3269_v15  ;;  %v2766_v37 = vld [vmem:[#allocation7 + $0x80] sm:$0xff]  }
  0x8b   : > { %vm3381_vm15 = vcmp.le.s32.totalorder %v580_v32, 6 }
  0x8c   : > { %2535 = vmatpush3.bf16.msra.mxu0 %v2724_v18 }
  0x8d   : > { %2536 = vmatprep.subr.bf16.mxu0 %v2727_v20 }
  0x8f   : > { %2529 = vmatmul.mubr.bf16.gmra.mxu0 %v348_v19 }
  0x90   : > { %2537 = vmatpush3.bf16.msra.mxu0 %v2727_v20  ;;  %v566_v20 = vand.u32 7, %v3243_v1  ;;  %v2761_v1 = vld [vmem:[#allocation7 + $0x50] sm:$0xff]  }
  0x91   : > { %2538 = vmatprep.subr.bf16.mxu0 %v2730_v21 }
  0x92   : > { %vm3320_vm11 = vcmp.le.s32.totalorder %v566_v20, 6 }
  0x94   : > { %2539 = vmatpush3.bf16.msra.mxu0 %v2730_v21 }
  0x95   : > { %2540 = vmatprep.subr.bf16.mxu0 %v2733_v24 }
  0x98   : > { %2541 = vmatpush3.bf16.msra.mxu0 %v2733_v24 }
  0x99   : > { %2542 = vmatprep.subr.bf16.mxu0 %v2736_v27 }
  0x9c   : > { %2543 = vmatpush3.bf16.msra.mxu0 %v2736_v27  ;;  %v559_v27 = vand.u32 7, %v3251_v6  ;;  %v2759_v6 = vld [vmem:[#allocation7 + $0x18] sm:$0xff]  }
  0x9d   : > { %2544 = vmatprep.subr.bf16.mxu0 %v2739_v30 }
  0x9e   : > { %vm3310_vm10 = vcmp.le.s32.totalorder %v559_v27, 6 }
  0x9f   : > { %vm2209_vm13 = vmpackc.low %vm3320_vm11, %vm3310_vm10 }
  0xa0   : > { %2545 = vmatpush3.bf16.msra.mxu0 %v2739_v30 }
  0xa1   : > { %2546 = vmatprep.subr.bf16.mxu0 %v2742_v33 }
  0xa4   : > { %2547 = vmatpush3.bf16.msra.mxu0 %v2742_v33 }
  0xa5   : > { %2556 = vmatprep.subr.bf16.mxu0 %v3209_v36 }
 0x147   : > { %v2526_v40 = vpop.f32.mrf.mxu0 }
 0x148   : > { %v488_v46 = vadd.f32 %v2526_v40, %v2154_v41 }
 0x149   : > { %v479_v43 = vpop.f32.mrf.mxu0 }
 0x14a   : > { %v480_v45 = vadd.f32 %v2154_v41, %v479_v43  ;;  %v3222_v56 = vmax.f32 %v488_v46, 0.0 }
 0x14b   : > { %v2527_v47 = vpop.f32.mrf.mxu0 }
 0x14c   : > { %v491_v50 = vadd.f32 %v2527_v47, %v2154_v41  ;;  %v3220_v54 = vmax.f32 %v480_v45, 0.0  ;;  %v716_v7 = vrot.slane %v3222_v56, 1  ;;  %v661_v63 = vrot.slane %v3222_v56, 7 }
 0x14d   : > { %v482_v51 = vpop.f32.mrf.mxu0 }
 0x14e   : > { %v483_v55 = vadd.f32 %v2154_v41, %v482_v51  ;;  %v3233_v61 = vmax.f32 %v491_v50, 0.0  ;;  %v713_v2 = vrot.slane %v3220_v54, 1  ;;  %v657_v33 = vrot.slane %v3220_v54, 7  ;;  %v2747_v50 = vld [vmem:[#allocation7 + $0x38] sm:$0xff]  }
 0x14f   : > { %v2530_v57 = vpop.f32.mrf.mxu0 }
 0x150   : > { %v3224_v58 = vmax.f32 %v483_v55, 0.0  ;;  %v504_v4 = vadd.f32 %v2530_v57, %v2154_v41  ;;  %v718_v16 = vrot.slane %v3233_v61, 1  ;;  %v2749_v57 = vld [vmem:[#allocation7 + $0x70] sm:$0xff]  }
 0x151   : > { %v495_v62 = vpop.f32.mrf.mxu0 }
 0x152   : > { %v714_v3 = vrot.slane %v3224_v58, 1  ;;  %v496_v8 = vadd.f32 %v2154_v41, %v495_v62  ;;  %v3256_v10 = vpack.c.bf16 %v3224_v58, %v3220_v54  ;;  %v3281_v21 = vmax.f32 %v504_v4, 0.0  ;;  %v2750_v4 = vld [vmem:[#allocation7 + $0x30] sm:$0xff]  }
 0x153   : > { %v2531_v9 = vpop.f32.mrf.mxu0  ;;  %v659_v25 = vrot.slane %v3224_v58, 7  ;;  %v3299_v34 = vsel %vm712_vm0, %v716_v7, %v718_v16  ;;  %v3352_v58 = vpack.c.bf16 %v3233_v61, %v3222_v56 }
 0x154   : > { %v507_v12 = vadd.f32 %v2531_v9, %v2154_v41  ;;  %v715_v13 = vsel %vm712_vm0, %v713_v2, %v714_v3  ;;  %v3272_v17 = vmax.f32 %v496_v8, 0.0  ;;  %1093 = vmatprep.mubr.bf16.mxu1 %v3256_v10  ;;  %v717_v19 = vsel %vm712_vm0, %v714_v3, %v716_v7  ;;  %v2752_v9 = vld [vmem:[#allocation7 + $0x68] sm:$0xff]  }
 0x155   : > { %v498_v18 = vpop.f32.mrf.mxu0  ;;  %v2204_v24 = vpack.c.bf16 %v717_v19, %v715_v13  ;;  %v724_v38 = vrot.slane %v3281_v21, 1  ;;  %v737_v45 = vsel %vm3235_vm2, %v715_v13, 0.0  ;;  %v3333_v47 = vsel %vm655_vm5, %v657_v33, %v659_v25 }
 0x156   : > { %v3283_v22 = vmax.f32 %v507_v12, 0.0  ;;  %v499_v23 = vadd.f32 %v2154_v41, %v498_v18  ;;  %v720_v26 = vrot.slane %v3272_v17, 1  ;;  %v2748_v41 = vld [vmem:[#allocation7 + $0xb0] sm:$0xff]   ;;  %v738_v51 = vsel %vm3239_vm3, %v717_v19, 0.0  ;;  %v2754_v18 = vld [vmem:[#allocation7 + $0xa0] sm:$0xff]  }
 0x157   : > { %2548 = vmatprep.mubr.msk.bf16.mxu0 %vm2203_vm7, %v2204_v24  ;;  %v663_v3 = vrot.slane %v3233_v61, 7  ;;  %vm769_vm2 = vcmask 1043456   ;;  %v3390_v54 = vsel %vm655_vm5, %v659_v25, %v661_v63  ;;  %vm3401_vm7 = vcmp.ge.s32.totalorder %v545_v49, 1  ;;  %v2755_v49 = vld [vmem:[#allocation7 + $0x60] sm:$0xff]   ;;  %v2757_v25 = vld [vmem:[#allocation7 + $0x98] sm:$0xff]  }
 0x158   : > { %v656_v29 = vrot.slane %v3283_v22, 7  ;;  %v3290_v30 = vmax.f32 %v499_v23, 0.0  ;;  %v3302_v35 = vsel %vm712_vm0, %v718_v16, %v720_v26  ;;  %v726_v44 = vrot.slane %v3283_v22, 1  ;;  %vm3395_vm3 = vmneg %vm769_vm2 }
 0x159   : > { %v2207_v39 = vpack.c.bf16 %v3302_v35, %v3299_v34  ;;  %v3413_v23 = vsel %vm655_vm5, %v661_v63, %v663_v3  ;;  %v739_v63 = vsel %vm3229_vm1, %v3299_v34, 0.0  ;;  %v771_v43 = vrot.slane %v3256_v10, 4 }
 0x15a   : > { %v722_v40 = vrot.slane %v3290_v30, 1  ;;  %v3330_v46 = vsel %vm655_vm5, %v656_v29, %v657_v33  ;;  %v3366_v7 = vsel %vm712_vm0, %v724_v38, %v726_v44  ;;  %v3371_v8 = vsel %vm712_vm0, %v726_v44, %v713_v2  ;;  %v2756_v33 = vld [vmem:[#allocation7 + $0x20] sm:$0xff]   ;;  %v2763_v44 = vld [vmem:[#allocation7 + $0x88] sm:$0xff]  }
 0x15b   : > { %2549 = vmatmul.mubr.msk.bf16.vlgmr.msra.gmra.mxu0 %vm2206_vm9, %v2207_v39  ;;  %v2192_v52 = vpack.c.bf16 %v3333_v47, %v3330_v46  ;;  %v2213_v2 = vpack.c.bf16 %v3371_v8, %v3366_v7  ;;  %vm3407_vm9 = vcmp.ge.s32.totalorder %v552_v59, 1  ;;  %v2195_v48 = vpack.c.bf16 %v3413_v23, %v3390_v54 }
 0x15c   : > { %v3344_v53 = vsel %vm712_vm0, %v720_v26, %v722_v40  ;;  %v3347_v55 = vsel %vm712_vm0, %v722_v40, %v724_v38  ;;  %2557 = vmatpush3.bf16.msra.mxu0 %v3209_v36  ;;  %v3362_v36 = vpack.c.bf16 %v738_v51, %v737_v45  ;;  %vm2212_vm0 = vmpackc.low %vm3381_vm15, %vm3375_vm14  ;;  %v667_v59 = vrot.slane %v3290_v30, 7  ;;  %v2758_v38 = vld [vmem:[#allocation7 + $0x58] sm:$0xff]   ;;  %v2760_v40 = vld [vmem:[#allocation7 + $0x90] sm:$0xff]  }
 0x15d   : > { %v2210_v62 = vpack.c.bf16 %v3347_v55, %v3344_v53  ;;  %2193 = vmatmul.mubr.msk.bf16.vlgmr.msra.gmra.mxu1 %vm2191_vm12, %v2192_v52  ;;  %2558 = vmatprep.subr.bf16.mxu0 %v2748_v41  ;;  %vm2194_vm12 = vmpackc.low %vm3407_vm9, %vm3401_vm7  ;;  %v3428_v24 = vpack.c.bf16 %v3290_v30, %v3272_v17  ;;  %v665_v26 = vrot.slane %v3272_v17, 7  ;;  %v669_v45 = vrot.slane %v3281_v21, 7  ;;  %v2764_v52 = vld [vmem:[#allocation7 + $0x48] sm:$0xff]   ;;  %v2781_v17 = vld [vmem:[#allocation7 + $0x218] sm:$0xff]  }
 0x15e   : > { %2393 = vmatpush3.bf16.msra.mxu1 %v2747_v50  ;;  %1101 = vmatprep.mubr.bf16.mxu1 %v3352_v58  ;;  %v772_v19 = vrot.slane %v3362_v36, 4  ;;  %v2762_v50 = vld [vmem:[#allocation7 + $0x10] sm:$0xff]   ;;  %v740_v51 = vsel %vm3265_vm6, %v3302_v35, 0.0  ;;  %vm3479_vm6 = vcmp.ge.s32.totalorder %v573_v28, 1  ;;  %v743_v31 = vsel %vm3375_vm14, %v3366_v7, 0.0  ;;  %v2789_v35 = vld [vmem:[#allocation7 + $0x188] sm:$0xff]  }
 0x15f   : > { %2552 = vmatprep.mubr.msk.bf16.mxu0 %vm2209_vm13, %v2210_v62  ;;  %2394 = vmatprep.subr.bf16.mxu1 %v2749_v57  ;;  %v3433_v39 = vsel %vm655_vm5, %v665_v26, %v667_v59  ;;  %vm3437_vm13 = vcmp.ge.s32.totalorder %v559_v27, 1  ;;  %v741_v57 = vsel %vm3310_vm10, %v3344_v53, 0.0  ;;  %v742_v62 = vsel %vm3320_vm11, %v3347_v55, 0.0  ;;  %v2768_v55 = vld [vmem:[#allocation7] sm:$0xff]  }
 0x160   : > { %2559 = vmatpush3.bf16.msra.mxu0 %v2748_v41  ;;  %v3448_v41 = vsel %vm655_vm5, %v663_v3, %v665_v26  ;;  %vm3485_vm10 = vcmp.ge.s32.totalorder %v580_v32, 1  ;;  %v3492_v60 = vsel %vm655_vm5, %v669_v45, %v656_v29  ;;  %v750_v28 = vpack.c.bf16 %v740_v51, %v739_v63  ;;  %v2767_v32 = vld [vmem:[#allocation7 + $0x40] sm:$0xff]   ;;  %v2769_v29 = vld [vmem:[#allocation7 + $0x238] sm:$0xff]  }
 0x161   : > { %2560 = vmatprep.subr.bf16.mxu0 %v2751_v0  ;;  %v2198_v27 = vpack.c.bf16 %v3433_v39, %v3448_v41  ;;  %vm2200_vm1 = vmpackc.low %vm3485_vm10, %vm3479_vm6  ;;  %v753_v34 = vpack.c.bf16 %v742_v62, %v741_v57  ;;  %v681_v53 = vsel %vm3247_vm4, %v3333_v47, 0.0  ;;  %v744_v5 = vsel %vm3381_vm15, %v3371_v8, 0.0  ;;  %v2773_v8 = vld [vmem:[#allocation7 + $0x1f0] sm:$0xff]   ;;  %v2787_v62 = vld [vmem:[#allocation7 + $0x208] sm:$0xff]  }
 0x162   : > { %2395 = vmatpush3.bf16.msra.mxu1 %v2750_v4  ;;  %v2770_v4 = vld [vmem:[#allocation7 + $0x1f8] sm:$0xff]   ;;  %v682_v56 = vsel %vm3401_vm7, %v3390_v54, 0.0  ;;  %v3525_v61 = vpack.c.bf16 %v744_v5, %v743_v31  ;;  %v683_v36 = vsel %vm3407_vm9, %v3413_v23, 0.0  ;;  %v2775_v54 = vld [vmem:[#allocation7 + $0x228] sm:$0xff]   ;;  %v781_v16 = vrot.slane %v3428_v24, 4  ;;  %v2778_v23 = vld [vmem:[#allocation7 + $0x220] sm:$0xff]  }
 0x163   : > { %2553 = vmatmul.mubr.msk.bf16.gmra.mxu0 %vm2212_vm0, %v2213_v2  ;;  %2396 = vmatprep.subr.bf16.mxu1 %v2752_v9  ;;  %vm3443_vm0 = vcmp.ge.s32.totalorder %v566_v20, 1  ;;  %v3458_v20 = vpack.c.bf16 %v3283_v22, %v3281_v21  ;;  %v3472_v21 = vsel %vm655_vm5, %v667_v59, %v669_v45  ;;  %v680_v22 = vsel %vm3292_vm8, %v3330_v46, 0.0  ;;  %v2772_v46 = vld [vmem:[#allocation7 + $0x230] sm:$0xff]   ;;  %v2771_v9 = vld [vmem:[#allocation7 + $0x1b8] sm:$0xff]  }
 0x164   : > { %2561 = vmatpush3.bf16.msra.mxu0 %v2751_v0  ;;  %2572 = vmatprep.mubr.msk.bf16.mxu0 %vm3395_vm3, %v772_v19  ;;  %v2201_v15 = vpack.c.bf16 %v3492_v60, %v3472_v21  ;;  %v777_v0 = vrot.slane %v750_v28, 4  ;;  %v745_v3 = vpack.c.bf16 %v681_v53, %v680_v22  ;;  %v783_v10 = vrot.slane %v753_v34, 4  ;;  %v2793_v28 = vld [vmem:[#allocation8 + $0x38] sm:$0xff]   ;;  %v2794_v34 = vld [vmem:[#allocation8 + $0x30] sm:$0xff]   ;;  %v2800_v53 = vld [vmem:[#allocation8] sm:$0xff]  }
 0x165   : > { %2196 = vmatmul.mubr.msk.bf16.gmra.mxu1 %vm2194_vm12, %v2195_v48  ;;  %2562 = vmatprep.subr.bf16.mxu0 %v2754_v18  ;;  %vm2197_vm12 = vmpackc.low %vm3443_vm0, %vm3437_vm13  ;;  %v748_v13 = vpack.c.bf16 %v683_v36, %v682_v56  ;;  %v789_v48 = vrot.slane %v3525_v61, 4  ;;  %v685_v12 = vsel %vm3443_vm0, %v3433_v39, 0.0  ;;  %v684_v26 = vsel %vm3437_vm13, %v3448_v41, 0.0  ;;  %v2798_v22 = vld [vmem:[#allocation8 + $0x10] sm:$0xff]  }
 0x166   : > { %2397 = vmatpush3.bf16.msra.mxu1 %v2753_v42  ;;  %1109 = vmatprep.mubr.bf16.mxu1 %v3428_v24  ;;  %v778_v47 = vsel %vm769_vm2, %v772_v19, %v777_v0  ;;  %v770_v2 = vrot.slane %v745_v3, 4  ;;  %v3523_v7 = vsel %vm769_vm2, %v777_v0, %v783_v10  ;;  %v2774_v19 = vld [vmem:[#allocation7 + $0x1b0] sm:$0xff]   ;;  %v2776_v42 = vld [vmem:[#allocation7 + $0x1e8] sm:$0xff]   ;;  %v2779_v24 = vld [vmem:[#allocation7 + $0x1e0] sm:$0xff]   ;;  %v686_v41 = vsel %vm3479_vm6, %v3472_v21, 0.0 }
 0x167   : > { %2398 = vmatprep.subr.bf16.mxu1 %v2755_v49  ;;  %v790_v49 = vsel %vm769_vm2, %v783_v10, %v789_v48  ;;  %v773_v59 = vrot.slane %v748_v13, 4  ;;  %v687_v45 = vsel %vm3485_vm10, %v3492_v60, 0.0  ;;  %v2786_v21 = vld [vmem:[#allocation7 + $0x190] sm:$0xff]  }
 0x168   : > { %2563 = vmatpush3.bf16.msra.mxu0 %v2754_v18  ;;  %v775_v18 = vrot.slane %v3352_v58, 4  ;;  %v754_v51 = vpack.c.bf16 %v687_v45, %v686_v41 }
 0x169   : > { %2564 = vmatprep.subr.bf16.mxu0 %v2757_v25 }
 0x16a   : > { %2399 = vmatpush3.bf16.msra.mxu1 %v2756_v33  ;;  %v3534_v58 = vsel %vm769_vm2, %v771_v43, %v775_v18  ;;  %v751_v33 = vpack.c.bf16 %v685_v12, %v684_v26  ;;  %v782_v39 = vsel %vm769_vm2, %v775_v18, %v781_v16  ;;  %v785_v63 = vrot.slane %v754_v51, 4 }
 0x16b   : > { %2400 = vmatprep.subr.bf16.mxu1 %v2758_v38  ;;  %v774_v38 = vsel %vm769_vm2, %v770_v2, %v773_v59 }
 0x16c   : > { %2565 = vmatpush3.bf16.msra.mxu0 %v2757_v25  ;;  %v2777_v25 = vld [vmem:[#allocation7 + $0x1a8] sm:$0xff]   ;;  %v779_v30 = vrot.slane %v751_v33, 4 }
 0x16d   : > { %2199 = vmatmul.mubr.msk.bf16.gmra.mxu1 %vm2197_vm12, %v2198_v27  ;;  %2566 = vmatprep.subr.bf16.mxu0 %v2760_v40  ;;  %v2784_v27 = vld [vmem:[#allocation7 + $0x210] sm:$0xff]  }
 0x16e   : > { %2401 = vmatpush3.bf16.msra.mxu1 %v2759_v6  ;;  %1117 = vmatprep.mubr.bf16.mxu1 %v3458_v20  ;;  %v2782_v6 = vld [vmem:[#allocation7 + $0x1d8] sm:$0xff]   ;;  %v786_v60 = vsel %vm769_vm2, %v779_v30, %v785_v63 }
 0x16f   : > { %2402 = vmatprep.subr.bf16.mxu1 %v2761_v1  ;;  %v2783_v1 = vld [vmem:[#allocation7 + $0x198] sm:$0xff]  }
 0x170   : > { %2567 = vmatpush3.bf16.msra.mxu0 %v2760_v40  ;;  %v2780_v40 = vld [vmem:[#allocation7 + $0x1a0] sm:$0xff]  }
 0x171   : > { %2568 = vmatprep.subr.bf16.mxu0 %v2763_v44 }
 0x172   : > { %2403 = vmatpush3.bf16.msra.mxu1 %v2762_v50  ;;  %v2785_v50 = vld [vmem:[#allocation7 + $0x1d0] sm:$0xff]  }
 0x173   : > { %2404 = vmatprep.subr.bf16.mxu1 %v2764_v52  ;;  %v780_v52 = vsel %vm769_vm2, %v773_v59, %v779_v30 }
 0x174   : > { %2569 = vmatpush3.bf16.msra.mxu0 %v2763_v44  ;;  %v787_v44 = vrot.slane %v3458_v20, 4  ;;  %v2788_v20 = vld [vmem:[#allocation7 + $0x1c8] sm:$0xff]  }
 0x175   : > { %2202 = vmatmul.mubr.msk.bf16.gmra.mxu1 %vm2200_vm1, %v2201_v15  ;;  %2570 = vmatprep.subr.bf16.mxu0 %v2766_v37  ;;  %v2795_v15 = vld [vmem:[#allocation8 + $0x28] sm:$0xff]  }
 0x176   : > { %2405 = vmatpush3.bf16.msra.mxu1 %v2765_v11  ;;  %2240 = vmatprep.mubr.msk.bf16.mxu1 %vm3395_vm3, %v771_v43  ;;  %v788_v57 = vsel %vm769_vm2, %v781_v16, %v787_v44  ;;  %v2792_v11 = vld [vmem:[#allocation7 + $0x180] sm:$0xff]   ;;  %v2797_v43 = vld [vmem:[#allocation8 + $0x18] sm:$0xff]  }
 0x177   : > { %2406 = vmatprep.subr.bf16.mxu1 %v2767_v32  ;;  %v2796_v32 = vld [vmem:[#allocation8 + $0x20] sm:$0xff]  }
 0x178   : > { %2571 = vmatpush3.bf16.msra.mxu0 %v2766_v37  ;;  %v2791_v37 = vld [vmem:[#allocation7 + $0x1c0] sm:$0xff]  }
 0x179   : > { %2580 = vmatprep.subr.bf16.mxu0 %v2769_v29 }
 0x17a   : > { %2407 = vmatpush3.bf16.msra.mxu1 %v2768_v55 }
 0x17b   : > { %2573 = vmatmul.mubr.bf16.vlgmr.msra.gmra.mxu0 %v778_v47  ;;  %2444 = vmatprep.subr.bf16.mxu1 %v2770_v4 }
 0x17c   : > { %2576 = vmatprep.mubr.bf16.mxu0 %v3523_v7  ;;  %2581 = vmatpush3.bf16.msra.mxu0 %v2769_v29  ;;  %v2799_v29 = vld [vmem:[#allocation8 + $0x8] sm:$0xff]  }
 0x17d   : > { %2242 = vmatmul.mubr.msk.bf16.vlgmr.msra.gmra.mxu1 %vm3395_vm3, %v770_v2  ;;  %2582 = vmatprep.subr.bf16.mxu0 %v2772_v46 }
 0x17e   : > { %2445 = vmatpush3.bf16.msra.mxu1 %v2771_v9  ;;  %1375 = vmatprep.mubr.bf16.mxu1 %v3534_v58 }
 0x17f   : > { %2446 = vmatprep.subr.bf16.mxu1 %v2773_v8 }
 0x180   : > { %2583 = vmatpush3.bf16.msra.mxu0 %v2772_v46 }
 0x181   : > { %2584 = vmatprep.subr.bf16.mxu0 %v2775_v54 }
 0x182   : > { %2447 = vmatpush3.bf16.msra.mxu1 %v2774_v19 }
 0x183   : > { %2577 = vmatmul.mubr.bf16.gmra.mxu0 %v790_v49  ;;  %2448 = vmatprep.subr.bf16.mxu1 %v2776_v42 }
 0x184   : > { %2585 = vmatpush3.bf16.msra.mxu0 %v2775_v54  ;;  %2596 = vmatprep.mubr.bf16.mxu0 %v778_v47 }
 0x185   : > { %1376 = vmatmul.mubr.bf16.gmra.mxu1 %v774_v38  ;;  %2586 = vmatprep.subr.bf16.mxu0 %v2778_v23 }
 0x186   : > { %2449 = vmatpush3.bf16.msra.mxu1 %v2777_v25  ;;  %1383 = vmatprep.mubr.bf16.mxu1 %v782_v39 }
 0x187   : > { %2450 = vmatprep.subr.bf16.mxu1 %v2779_v24 }
 0x188   : > { %2587 = vmatpush3.bf16.msra.mxu0 %v2778_v23 }
 0x189   : > { %2588 = vmatprep.subr.bf16.mxu0 %v2781_v17 }
 0x18a   : > { %2451 = vmatpush3.bf16.msra.mxu1 %v2780_v40 }
 0x18b   : > { %2452 = vmatprep.subr.bf16.mxu1 %v2782_v6 }
 0x18c   : > { %2589 = vmatpush3.bf16.msra.mxu0 %v2781_v17 }
 0x18d   : > { %1384 = vmatmul.mubr.bf16.gmra.mxu1 %v780_v52  ;;  %2590 = vmatprep.subr.bf16.mxu0 %v2784_v27 }
 0x18e   : > { %2453 = vmatpush3.bf16.msra.mxu1 %v2783_v1  ;;  %1391 = vmatprep.mubr.bf16.mxu1 %v788_v57 }
 0x18f   : > { %2454 = vmatprep.subr.bf16.mxu1 %v2785_v50 }
 0x190   : > { %2591 = vmatpush3.bf16.msra.mxu0 %v2784_v27 }
 0x191   : > { %2592 = vmatprep.subr.bf16.mxu0 %v2787_v62 }
 0x192   : > { %2455 = vmatpush3.bf16.msra.mxu1 %v2786_v21 }
 0x193   : > { %2456 = vmatprep.subr.bf16.mxu1 %v2788_v20 }
 0x194   : > { %2593 = vmatpush3.bf16.msra.mxu0 %v2787_v62 }
 0x195   : > { %1392 = vmatmul.mubr.bf16.gmra.mxu1 %v786_v60  ;;  %2594 = vmatprep.subr.bf16.mxu0 %v2790_v14 }
 0x196   : > { %2457 = vmatpush3.bf16.msra.mxu1 %v2789_v35  ;;  %1690 = vmatprep.mubr.bf16.mxu1 %v3534_v58 }
 0x197   : > { %2458 = vmatprep.subr.bf16.mxu1 %v2791_v37 }
 0x198   : > { %2595 = vmatpush3.bf16.msra.mxu0 %v2790_v14 }
 0x19a   : > { %2459 = vmatpush3.bf16.msra.mxu1 %v2792_v11 }
 0x19b   : > { %2597 = vmatmul.mubr.bf16.vlgmr.msra.gmra.mxu0 %v3523_v7  ;;  %2604 = vmatprep.subr.bf16.mxu1 %v2793_v28 }
 0x19c   : > { %2600 = vmatprep.mubr.bf16.mxu0 %v790_v49 }
 0x19d   : > { %1691 = vmatmul.mubr.bf16.vlgmr.msra.gmra.mxu1 %v774_v38 }
 0x19e   : > { %1698 = vmatprep.mubr.bf16.mxu1 %v782_v39  ;;  %2605 = vmatpush3.bf16.msra.mxu1 %v2793_v28 }
 0x19f   : > { %2606 = vmatprep.subr.bf16.mxu1 %v2794_v34 }
 0x1a2   : > { %2607 = vmatpush3.bf16.msra.mxu1 %v2794_v34 }
 0x1a3   : > { %2601 = vmatmul.mubr.msk.bf16.gmra.mxu0 %vm769_vm2, %v789_v48  ;;  %2608 = vmatprep.subr.bf16.mxu1 %v2795_v15 }
 0x1a5   : > { %1699 = vmatmul.mubr.bf16.gmra.mxu1 %v780_v52 }
 0x1a6   : > { %1706 = vmatprep.mubr.bf16.mxu1 %v788_v57  ;;  %2609 = vmatpush3.bf16.msra.mxu1 %v2795_v15 }
 0x1a7   : > { %2610 = vmatprep.subr.bf16.mxu1 %v2796_v32 }
 0x1aa   : > { %2611 = vmatpush3.bf16.msra.mxu1 %v2796_v32 }
 0x1ab   : > { %2612 = vmatprep.subr.bf16.mxu1 %v2797_v43 }
 0x1ad   : > { %1707 = vmatmul.mubr.bf16.gmra.mxu1 %v786_v60 }
 0x1ae   : > { %2269 = vmatprep.mubr.msk.bf16.mxu1 %vm769_vm2, %v787_v44  ;;  %2613 = vmatpush3.bf16.msra.mxu1 %v2797_v43 }
 0x1af   : > { %2614 = vmatprep.subr.bf16.mxu1 %v2798_v22 }
 0x1b2   : > { %2615 = vmatpush3.bf16.msra.mxu1 %v2798_v22 }
 0x1b3   : > { %2616 = vmatprep.subr.bf16.mxu1 %v2799_v29 }
 0x1b5   : > { %2270 = vmatmul.mubr.msk.bf16.gmra.mxu1 %vm769_vm2, %v785_v63 }
 0x1b6   : > { %2617 = vmatpush3.bf16.msra.mxu1 %v2799_v29 }
 0x1b7   : > { %2618 = vmatprep.subr.bf16.mxu1 %v2800_v53 }
 0x1ba   : > { %2619 = vmatpush3.bf16.msra.mxu1 %v2800_v53 }
 0x21b   : > { %v3567_v0 = vpop.f32.mrf.mxu0 }
 0x21d   : > { %v2356_v55 = vpop.f32.mrf.mxu1  ;;  %v1160_v31 = vpop.f32.mrf.mxu0 }
 0x21f   : > { %v2357_v3 = vpop.f32.mrf.mxu1  ;;  %v3569_v47 = vpop.f32.mrf.mxu0 }
 0x220   : > { %v2358_v10 = vadd.f32 %v2357_v3, %v2356_v55 }
 0x221   : > { %v2359_v4 = vpop.f32.mrf.mxu1  ;;  %v1163_v56 = vpop.f32.mrf.mxu0 }
 0x222   : > { %v1161_v60 = vadd.f32 %v2358_v10, %v1160_v31 }
 0x223   : > { %v2360_v5 = vpop.f32.mrf.mxu1  ;;  %v3571_v61 = vpop.f32.mrf.mxu0 }
 0x224   : > { %v2361_v11 = vadd.f32 %v2360_v5, %v2359_v4 }
 0x225   : > { %v2362_v46 = vpop.f32.mrf.mxu1  ;;  %v3577_v13 = vpop.f32.mrf.mxu0 }
 0x226   : > { %v1164_v22 = vadd.f32 %v2361_v11, %v1163_v56  ;;  %v3613_v56 = vld [vmem:[%s3712_s4] ss:$0 sm:$0xff] }
 0x227   : > { %v2363_v9 = vpop.f32.mrf.mxu1  ;;  %v3581_v48 = vpop.f32.mrf.mxu0 }
 0x228   : > { %v2364_v2 = vadd.f32 %v2363_v9, %v2362_v46 }
 0x229   : > { %v2365_v18 = vpop.f32.mrf.mxu1  ;;  %v3587_v49 = vpop.f32.mrf.mxu0 }
 0x22b   : > { %v2366_v7 = vpop.f32.mrf.mxu1 }
 0x22d   : > { %v2368_v8 = vpop.f32.mrf.mxu1 }
 0x22f   : > { %v2369_v36 = vpop.f32.mrf.mxu1 }
 0x230   : > { %v3573_v58 = vadd.f32 %v2369_v36, %v2368_v8  ;;  %v1169_v36 = vadd.f32 %v3567_v0, %v2364_v2 }
 0x231   : > { %v3575_v54 = vpop.f32.mrf.mxu1 }
 0x233   : > { %v3579_v19 = vpop.f32.mrf.mxu1 }
 0x235   : > { %v2374_v42 = vpop.f32.mrf.mxu1 }
 0x237   : > { %v2375_v16 = vpop.f32.mrf.mxu1 }
 0x238   : > { %v3583_v12 = vadd.f32 %v2375_v16, %v2374_v42  ;;  %v2367_v16 = vadd.f32 %v2366_v7, %v2365_v18 }
 0x239   : > { %v3585_v23 = vpop.f32.mrf.mxu1 }
 0x23b   : > { %v3589_v59 = vpop.f32.mrf.mxu1  ;;  %v2574_v25 = vpop.f32.mrf.mxu0 }
 0x23d   : > { %v2408_v26 = vpop.f32.mrf.mxu1  ;;  %v1434_v33 = vpop.f32.mrf.mxu0 }
 0x23f   : > { %v2409_v24 = vpop.f32.mrf.mxu1  ;;  %v3591_v17 = vpop.f32.mrf.mxu0 }
 0x240   : > { %v2410_v14 = vadd.f32 %v2409_v24, %v2408_v26 }
 0x241   : > { %v2411_v38 = vpop.f32.mrf.mxu1  ;;  %v1437_v30 = vpop.f32.mrf.mxu0 }
 0x242   : > { %v1370_v15 = vadd.f32 %v2410_v14, %v1161_v60 }
 0x243   : > { %v2412_v39 = vpop.f32.mrf.mxu1  ;;  %v3593_v1 = vpop.f32.mrf.mxu0 }
 0x244   : > { %v2413_v32 = vadd.f32 %v2412_v39, %v2411_v38  ;;  %v1435_v46 = vadd.f32 %v1434_v33, %v1370_v15 }
 0x245   : > { %v2414_v40 = vpop.f32.mrf.mxu1  ;;  %v3595_v50 = vpop.f32.mrf.mxu0 }
 0x246   : > { %v1373_v9 = vadd.f32 %v2413_v32, %v1164_v22 }
 0x247   : > { %v2415_v6 = vpop.f32.mrf.mxu1  ;;  %v3597_v57 = vpop.f32.mrf.mxu0 }
 0x248   : > { %v2416_v53 = vadd.f32 %v2415_v6, %v2414_v40  ;;  %v1438_v24 = vadd.f32 %v1437_v30, %v1373_v9  ;;  %v1172_v40 = vadd.f32 %v3569_v47, %v2367_v16  ;;  %v1177_v30 = vadd.f32 %v3573_v58, %v3577_v13 }
 0x249   : > { %v2417_v41 = vpop.f32.mrf.mxu1  ;;  %v3603_v20 = vpop.f32.mrf.mxu0 }
 0x24a   : > { %v1378_v4 = vadd.f32 %v2416_v53, %v1169_v36  ;;  %v2379_v36 = vadd.f32 %v3589_v59, %v3585_v23 }
 0x24b   : > { %v2418_v27 = vpop.f32.mrf.mxu1 }
 0x24c   : > { %v2419_v38 = vadd.f32 %v2418_v27, %v2417_v41  ;;  %v1443_v18 = vadd.f32 %v2574_v25, %v1378_v4  ;;  %v2373_v41 = vadd.f32 %v3579_v19, %v3575_v54 }
 0x24d   : > { %v2420_v44 = vpop.f32.mrf.mxu1 }
 0x24e   : > { %v1381_v60 = vadd.f32 %v2419_v38, %v1172_v40 }
 0x24f   : > { %v2421_v45 = vpop.f32.mrf.mxu1 }
 0x250   : > { %v2422_v11 = vadd.f32 %v2421_v45, %v2420_v44  ;;  %v1446_v53 = vadd.f32 %v3591_v17, %v1381_v60 }
 0x251   : > { %v2423_v51 = vpop.f32.mrf.mxu1 }
 0x252   : > { %v1386_v44 = vadd.f32 %v2422_v11, %v1177_v30 }
 0x253   : > { %v2424_v52 = vpop.f32.mrf.mxu1 }
 0x254   : > { %v2425_v22 = vadd.f32 %v2424_v52, %v2423_v51  ;;  %v1451_v51 = vadd.f32 %v3595_v50, %v1386_v44 }
 0x255   : > { %v3599_v62 = vpop.f32.mrf.mxu1 }
 0x257   : > { %v3601_v21 = vpop.f32.mrf.mxu1 }
 0x258   : > { %v2428_v52 = vadd.f32 %v3601_v21, %v3599_v62 }
 0x259   : > { %v3605_v63 = vpop.f32.mrf.mxu1 }
 0x25b   : > { %v2598_v35 = vpop.f32.mrf.mxu0  ;;  %v3607_v37 = vpop.f32.mrf.mxu1 }
 0x25c   : > { %v2431_v62 = vadd.f32 %v3607_v37, %v3605_v63 }
 0x25d   : > { %v1757_v28 = vpop.f32.mrf.mxu0  ;;  %v2460_v34 = vpop.f32.mrf.mxu1 }
 0x25f   : > { %v2461_v43 = vpop.f32.mrf.mxu1  ;;  %v2599_v55 = vpop.f32.mrf.mxu0 }
 0x260   : > { %v2462_v29 = vadd.f32 %v2461_v43, %v2460_v34 }
 0x261   : > { %v2463_v3 = vpop.f32.mrf.mxu1  ;;  %v1760_v31 = vpop.f32.mrf.mxu0 }
 0x262   : > { %v1758_v8 = vadd.f32 %v2462_v29, %v1757_v28 }
 0x263   : > { %v2464_v42 = vpop.f32.mrf.mxu1  ;;  %v2602_v7 = vpop.f32.mrf.mxu0 }
 0x264   : > { %v1788_v26 = vadd.f32 %v1758_v8, %v1435_v46  ;;  %v2465_v10 = vadd.f32 %v2464_v42, %v2463_v3  ;;  %v1180_v3 = vadd.f32 %v2373_v41, %v3587_v49  ;;  %v1185_v49 = vadd.f32 %v3571_v61, %v3583_v12 }
 0x265   : > { %v2466_v5 = vpop.f32.mrf.mxu1  ;;  %v1773_v25 = vpop.f32.mrf.mxu0  ;;  %v1188_v61 = vadd.f32 %v3581_v48, %v2379_v36  ;;  %v2807_v36 = vld [vmem:[%s3191_s12 + $0x18] sm:$0xff]  }
 0x266   : > { %v1761_v39 = vadd.f32 %v2465_v10, %v1760_v31  ;;  %v1803_v2 = vadd.f32 %v3613_v56, %v1788_v26  ;;  %v1389_v19 = vadd.f32 %v2425_v22, %v1180_v3  ;;  %v2806_v22 = vld [vmem:[%s3191_s12] sm:$0xff]  }
 0x267   : > { %v2467_v33 = vpop.f32.mrf.mxu1  ;;  %v2603_v9 = vpop.f32.mrf.mxu0 }
 0x268   : > { %v1789_v6 = vadd.f32 %v1761_v39, %v1438_v24  ;;  %v2468_v0 = vadd.f32 %v2467_v33, %v2466_v5  ;;  %v1811_v32 = vmax.f32 %v1803_v2, 0.0  ;;  %v1454_v31 = vadd.f32 %v3603_v20, %v1389_v19 }
 0x269   : > { %v2469_v14 = vpop.f32.mrf.mxu1  ;;  %v1776_v50 = vpop.f32.mrf.mxu0  ;;  %v1394_v24 = vadd.f32 %v2428_v52, %v1185_v49  ;;  %v1397_v20 = vadd.f32 %v2431_v62, %v1188_v61 }
 0x26a   : > { %v1766_v28 = vadd.f32 %v2598_v35, %v2468_v0  ;;  %v1804_v34 = vadd.f32 %v3613_v56, %v1789_v6 }
 0x26b   : > { %v2470_v27 = vpop.f32.mrf.mxu1  ;;  %v1459_v40 = vadd.f32 %v3593_v1, %v1394_v24  ;;  %v1462_v48 = vadd.f32 %v3597_v57, %v1397_v20  ;;  %v2805_v57 = vld [vmem:[%s3191_s12 + $0x8] sm:$0xff]  }
 0x26c   : > { %v1790_v47 = vadd.f32 %v1766_v28, %v1443_v18  ;;  %v2471_v15 = vadd.f32 %v2470_v27, %v2469_v14  ;;  %v1812_v43 = vmax.f32 %v1804_v34, 0.0  ;;  %v2273_v27 = vld [vmem:[%s3714_s6] ss:$0 sm:$0xff] }
 0x26d   : > { %v2472_v29 = vpop.f32.mrf.mxu1 }
 0x26e   : > { %v1769_v45 = vadd.f32 %v2599_v55, %v2471_v15  ;;  %v1819_v35 = vpack.c.bf16 %v1812_v43, %v1811_v32  ;;  %v1805_v58 = vadd.f32 %v3613_v56, %v1790_v47  ;;  %v1961_v32 = vunpack.c.l.bf16 %v2805_v57 }
 0x26f   : > { %v2473_v46 = vpop.f32.mrf.mxu1 }
 0x270   : > { %v1791_v13 = vadd.f32 %v1769_v45, %v1446_v53  ;;  %v2474_v54 = vadd.f32 %v2473_v46, %v2472_v29  ;;  %2620 = vmatprep.mubr.bf16.mxu1 %v1819_v35  ;;  %v1813_v16 = vmax.f32 %v1805_v58, 0.0  ;;  %v1962_v53 = vunpack.c.h.bf16 %v2805_v57 }
 0x271   : > { %v2475_v8 = vpop.f32.mrf.mxu1 }
 0x272   : > { %v1806_v17 = vadd.f32 %v3613_v56, %v1791_v13  ;;  %v1774_v55 = vadd.f32 %v2474_v54, %v1773_v25  ;;  %v1959_v25 = vunpack.c.l.bf16 %v2806_v22 }
 0x273   : > { %v2476_v42 = vpop.f32.mrf.mxu1 }
 0x274   : > { %v1814_v26 = vmax.f32 %v1806_v17, 0.0  ;;  %v1792_v10 = vadd.f32 %v1774_v55, %v1451_v51  ;;  %v2477_v4 = vadd.f32 %v2476_v42, %v2475_v8  ;;  %v1965_v42 = vunpack.c.l.bf16 %v2807_v36 }
 0x275   : > { %v2478_v5 = vpop.f32.mrf.mxu1 }
 0x276   : > { %v1820_v21 = vpack.c.bf16 %v1814_v26, %v1813_v16  ;;  %v1777_v38 = vadd.f32 %v2477_v4, %v1776_v50  ;;  %v1807_v59 = vadd.f32 %v3613_v56, %v1792_v10  ;;  %v2808_v10 = vld [vmem:[%s3191_s12 + $0x10] sm:$0xff]   ;;  %s2915_s12 = scalar_lea.vmem %s3658_s21, 512 }
 0x277   : > { %v2479_v39 = vpop.f32.mrf.mxu1  ;;  %v1963_v4 = vunpack.c.l.bf16 %v2808_v10  ;;  %v1964_v62 = vunpack.c.h.bf16 %v2808_v10  ;;  %p2916_p7 = scmp.ne.s32.totalorder %s3658_s21, %s2915_s12  ;;  %p2923_p0 = scmp.lt.s32.totalorder %s2921_s9, %s2915_s12 }
 0x278   : > { %v1793_v12 = vadd.f32 %v1777_v38, %v1454_v31  ;;  %v2480_v23 = vadd.f32 %v2479_v39, %v2478_v5  ;;  %2621 = vmatmul.mubr.bf16.vlgmr.msra.gmra.mxu1 %v1820_v21  ;;  %v1815_v37 = vmax.f32 %v1807_v59, 0.0  ;;  %v1966_v31 = vunpack.c.h.bf16 %v2807_v36 }
 0x279   : > { %v2481_v33 = vpop.f32.mrf.mxu1  ;;  %p2917_p12 = pnand %p2916_p7, %p3772_p1  ;;  %p2924_p2 = por %p2923_p0, %p2922_p13 }
 0x27a   : > { %v1782_v6 = vadd.f32 %v2602_v7, %v2480_v23  ;;  %v1808_v0 = vadd.f32 %v3613_v56, %v1793_v12 }
 0x27b   : > { %v2482_v2 = vpop.f32.mrf.mxu1  ;;  %p2918_p9 = pneg %p2917_p12 }
 0x27c   : > { %v1794_v18 = vadd.f32 %v1782_v6, %v1459_v40  ;;  %v2483_v63 = vadd.f32 %v2482_v2, %v2481_v33  ;;  %v1816_v14 = vmax.f32 %v1808_v0, 0.0 }
 0x27d   : > { %p2925_p10 = pnand %p2924_p2, %p2918_p9 }
 0x27e   : > { %v1785_v60 = vadd.f32 %v2603_v9, %v2483_v63  ;;  %v1821_v11 = vpack.c.bf16 %v1816_v14, %v1815_v37  ;;  %v1809_v34 = vadd.f32 %v3613_v56, %v1794_v18 }
 0x280   : > { %v1795_v28 = vadd.f32 %v1785_v60, %v1462_v48  ;;  %2624 = vmatprep.mubr.bf16.mxu1 %v1821_v11  ;;  %v1817_v7 = vmax.f32 %v1809_v34, 0.0 }
 0x282   : > { %v1810_v1 = vadd.f32 %v3613_v56, %v1795_v28  ;;  %v1960_v56 = vunpack.c.h.bf16 %v2806_v22 }
 0x284   : > { %v1818_v30 = vmax.f32 %v1810_v1, 0.0 }
 0x286   : > { %v1822_v41 = vpack.c.bf16 %v1818_v30, %v1817_v7 }
 0x288   : > { %2625 = vmatmul.mubr.bf16.gmra.mxu1 %v1822_v41 }
 0x338   : > { %v2622_v47 = vpop.f32.mrf.mxu1 }
 0x339   : > { %v1937_v15 = vadd.f32 %v2622_v47, %v2273_v27 }
 0x33a   : > { %v1928_v43 = vpop.f32.mrf.mxu1 }
 0x33b   : > { %v1929_v29 = vadd.f32 %v2273_v27, %v1928_v43  ;;  %v1969_v45 = vadd.f32 %v1961_v32, %v1937_v15 }
 0x33c   : > { %v2623_v44 = vpop.f32.mrf.mxu1 }
 0x33d   : > { %v1940_v35 = vadd.f32 %v2623_v44, %v2273_v27  ;;  %v1967_v46 = vadd.f32 %v1959_v25, %v1929_v29  ;;  %v1977_v54 = vmax.f32 %v1969_v45, 0.0 }
 0x33e   : > { %v1931_v3 = vpop.f32.mrf.mxu1 }
 0x33f   : > { %v1970_v58 = vadd.f32 %v1962_v53, %v1940_v35  ;;  %v1932_v13 = vadd.f32 %v2273_v27, %v1931_v3  ;;  %v1975_v8 = vmax.f32 %v1967_v46, 0.0 }
 0x341   : > { %v1978_v19 = vmax.f32 %v1970_v58, 0.0  ;;  %v1968_v9 = vadd.f32 %v1960_v56, %v1932_v13 }
 0x343   : > { %v2313_v51 = vpack.c.bf16 %v1978_v19, %v1977_v54  ;;  %v1976_v52 = vmax.f32 %v1968_v9, 0.0 }
 0x345   : > { %2325 = vst [vmem:[%s3650_s11 + $0x8] sm:$0xff] %v2313_v51   ;;  %v2308_v17 = vpack.c.bf16 %v1976_v52, %v1975_v8 }
 0x347   : > { %2309 = vst [vmem:[%s3650_s11] sm:$0xff] %v2308_v17  }
 0x348   : > { %v2626_v55 = vpop.f32.mrf.mxu1 }
 0x349   : > { %v1953_v49 = vadd.f32 %v2626_v55, %v2273_v27 }
 0x34a   : > { %v1944_v16 = vpop.f32.mrf.mxu1 }
 0x34b   : > { %v1945_v26 = vadd.f32 %v2273_v27, %v1944_v16  ;;  %v1973_v5 = vadd.f32 %v1965_v42, %v1953_v49 }
 0x34c   : > { %v2627_v50 = vpop.f32.mrf.mxu1 }
 0x34d   : > { %v1956_v24 = vadd.f32 %v2627_v50, %v2273_v27  ;;  %v1971_v38 = vadd.f32 %v1963_v4, %v1945_v26  ;;  %v1981_v12 = vmax.f32 %v1973_v5, 0.0 }
 0x34e   : > { %v1947_v21 = vpop.f32.mrf.mxu1 }
 0x34f   : > { %v1974_v39 = vadd.f32 %v1966_v31, %v1956_v24  ;;  %v1948_v61 = vadd.f32 %v2273_v27, %v1947_v21  ;;  %v1979_v33 = vmax.f32 %v1971_v38, 0.0 }
 0x351   : > { %v1982_v23 = vmax.f32 %v1974_v39, 0.0  ;;  %v1972_v59 = vadd.f32 %v1964_v62, %v1948_v61 }
 0x353   : > { %v2323_v40 = vpack.c.bf16 %v1982_v23, %v1981_v12  ;;  %v1980_v20 = vmax.f32 %v1972_v59, 0.0 }
 0x355   : > { %2327 = vst [vmem:[%s3650_s11 + $0x18] sm:$0xff] %v2323_v40   ;;  %v2318_v6 = vpack.c.bf16 %v1980_v20, %v1979_v33 }
 0x357   : > { %2326 = vst [vmem:[%s3650_s11 + $0x10] sm:$0xff] %v2318_v6  }
 0x358   : > { %2928 = shalt.err (!%p2925_p10)
}
 0x359   : > { %s2929_s10 = scalar_lea.hbm %s3663_s1, 512  ;;  %s2933_s29 = scalar_lea.hbm %s3715_s7, 1024 }
 0x35a   : > { %p2930_p6 = scmp.ne.s32.totalorder %s3663_s1, %s2929_s10  ;;  %p2934_p3 = scmp.lt.s32.totalorder %s3663_s1, %s3715_s7 }
 0x35b   : > { %p2935_p11 = scmp.lt.s32.totalorder %s2933_s29, %s2929_s10 }
 0x35c   : > { %p2931_p4 = pnand %p2930_p6, %p3772_p1 }
 0x35d   : > { %p2936_p5 = por %p2935_p11, %p2934_p3 }
 0x35e   : > { %p2932_p8 = pneg %p2931_p4 }
 0x360   : > { %p2937_p7 = pnand %p2936_p5, %p2932_p8 }
 0x362   : > { %2940 = shalt.err (!%p2937_p7)
}
 0x363   : > { %s2996_s18 = smov 64   ;;  %s2997_s23 = smov 4  }
 0x364   : > { %2642 = dma.vmem_to_hbm [thread:$0]  (%p3772_p1), %s3658_s21, 512, %s3663_s1, %s2024_s16, %s2996_s18, %s2996_s18, %s2997_s23  }
 0x365 PF: > { %s2052_s12 = sand.u32 1, %s2975_s24   ;;  %p3773_p12 = scmp.ne.s32.totalorder %s3724_s8, 0 }
 0x366   : > { %p3774_p9 = scmp.ge.s32.totalorder %s2987_s27, 2  ;;  %s2053_s28 = scalar_lea.sflag [#allocation4], %s2052_s12 }
 0x368   : > { %p2659_p13 = pnand %p3774_p9, %p3773_p12 }
 0x36a   : > { %p2660_p0 = pneg %p2659_p13 }
 0x36c   : > { %2970 = dma.done.wait (%p2660_p0), %s2053_s28, 512  }
 0x36d   : > { %2972 = vsyncadd (%p2660_p0), %s2053_s28, 4294966784  ;;  %p22_p2 = scmp.ge.s32.totalorder %s3127_s14, 4   ;;  %s3775_s24 = smov %s2979_s25 }
 0x36e   : > { %s3776_s25 = smov %s2983_s26  ;;  %s3777_s26 = smov %s3137_s17 }
 0x36f   : > { %s3778_s27 = smov %s3127_s14  ;;  %24 = sbr.rel (!%p22_p2) target bundleno = 9 (0x9), region = 107 }
 0x374   :  { %2058 = vsyncpa [#allocation3], 1 }
 0x375   :  { %2060 = vsyncpa [#allocation3 + $0x1], 1 }
 0x376   :  { %2061 = vsyncpa [#allocation6], 1 }
 0x377   :  { %2062 = vsyncpa [#allocation9], 1 }
 0x378   :  { %2063 = vsyncpa [#allocation4], 1 }
 0x379   :  { %2065 = vsyncpa [#allocation4 + $0x1], 1 }

</bundles_post_ra>
